<compile_context>
chip_gen: v7x
topology: tpu7x:2x2x1
jax: 0.10.0
libtpu: 0.0.40
codegen_flags: <defaults>
</compile_context>

<pallas_src>
import jax
import jax.numpy as jnp
from jax import lax
from jax.experimental import pallas as pl
from jax.experimental.pallas import tpu as pltpu

# ---------------------------------------------------------------------------
# Small shapes consistent with the forward pass
# ---------------------------------------------------------------------------
BS = 2            # batch
HID = 128         # __C.HIDDEN_SIZE
VIS_DIM = 1024    # fixed by nn.Linear(1024, HIDDEN_SIZE)
H = W = 8         # spatial size of fused feature map x_[0]
GRIDNUM = H * W
ANCNUM = 3        # anchors per grid cell
CLASS_NUM = 3
CH = CLASS_NUM + 5
SELECT_NUM = 16   # __C.SELECT_NUM


# ---------------------------------------------------------------------------
# Fused Pallas kernel: linear_vs + linear_ts + head + get_boxes, one batch/step
# ---------------------------------------------------------------------------
def _fused_net_kernel(idx_ref, x_ref, wvs_ref, bvs_ref, y_ref, wts_ref,
                      bts_ref, boxes_ref, out_ref):
    """One grid step = one batch element.

    idx_ref   : (1, S, 1)        int32  top-k grid indices (order irrelevant)
    x_ref     : (1, D, G)        f32    fused visual feature map, channel-major
    wvs_ref   : (HID, D)         bf16   linear_vs weight (torch (out,in) layout)
    bvs_ref   : (HID, 1)         f32    linear_vs bias (column)
    y_ref     : (1, 1, HID)      f32    flat_lang_feat
    wts_ref   : (HID, HID)       bf16   linear_ts weight, stored (in,out)
    bts_ref   : (1, HID)         f32    linear_ts bias
    boxes_ref : (1, G, A*CH)     f32    boxes_sml[0], anchors flattened on lanes
    out_ref   : (1, 1, 128)      f32    lanes 0..4 = (x1,y1,x2,y2,obj), lane 5 = maxval
    """
    G = x_ref.shape[2]
    S = idx_ref.shape[1]
    ACH = boxes_ref.shape[2]

    # --- linear_vs over ALL grid cells: (HID,D) @ (D,G) -> (HID,G) on the MXU;
    #     the (D,G)->(G,D) transpose never exists anywhere. ---
    x = x_ref[0].astype(jnp.bfloat16)                                    # (D, G)
    xp = jnp.dot(wvs_ref[...], x, preferred_element_type=jnp.float32)   # (HID, G)
    xp = xp + bvs_ref[...]                                               # +(HID,1)

    # --- linear_ts on the language feature ---
    y = y_ref[0].astype(jnp.bfloat16)                                    # (1, HID)
    yp = jnp.dot(y, wts_ref[...],
                 preferred_element_type=jnp.float32) + bts_ref[...]      # (1, HID)

    # TODO(synk): WeakREChead source not provided; stand-in scoring = cosine
    # similarity between each cell feature and the language feature (same
    # eval-time interface: one-hot prediction + max score).
    inv_xn = lax.rsqrt(jnp.sum(xp * xp, axis=0, keepdims=True) + 1e-6)   # (1, G)
    inv_yn = lax.rsqrt(jnp.sum(yp * yp, axis=1, keepdims=True) + 1e-6)   # (1, 1)
    s = jnp.dot(yp, xp, preferred_element_type=jnp.float32)              # (1, G)
    s = s * inv_xn * inv_yn

    # --- restrict the argmax to the top-k selected cells.  Grid-ascending
    #     order reproduces torch's masked_select order + first-argmax. ---
    idx = idx_ref[0]                                                     # (S, 1)
    giota = lax.broadcasted_iota(jnp.int32, (S, G), 1)
    hit = jnp.max((giota == idx).astype(jnp.float32), axis=0, keepdims=True)
    selected = hit > 0.5                                                 # (1, G)

    sm = jnp.where(selected, s, -1e30)
    maxv = jnp.max(sm, axis=1, keepdims=True)                            # (1, 1)
    col = lax.broadcasted_iota(jnp.int32, (1, G), 1)
    gsel = jnp.min(jnp.where(sm >= maxv, col, G), axis=1, keepdims=True)  # (1,1)

    # --- get_boxes(): gather chosen grid cell (one-hot reduce, all 2D) ---
    rowg = lax.broadcasted_iota(jnp.int32, (G, 1), 0)
    onehot = (rowg == gsel).astype(jnp.float32)                          # (G, 1)
    chosen = jnp.sum(boxes_ref[0] * onehot, axis=0, keepdims=True)       # (1, A*CH)

    # anchor argmax over objectness (field index 4 within each CH-lane group)
    lane = lax.broadcasted_iota(jnp.int32, (1, ACH), 1)
    fld = lane % CH
    obj_mask = fld == 4
    omax = jnp.max(jnp.where(obj_mask, chosen, -1e30), axis=1, keepdims=True)
    obj_lane = jnp.min(jnp.where(obj_mask & (chosen >= omax), lane, ACH),
                       axis=1, keepdims=True)                            # (1, 1)
    abase = obj_lane - 4
    amask = (lane >= abase) & (lane < abase + CH)                        # (1, ACH)

    def pick(f):
        return jnp.sum(jnp.where(amask & (fld == f), chosen, 0.0),
                       axis=1, keepdims=True)                            # (1, 1)

    cx, cy, ww, hh, ob = pick(0), pick(1), pick(2), pick(3), pick(4)
    x1 = cx - ww * 0.5
    y1 = cy - hh * 0.5
    x2 = x1 + ww          # in-place semantics of the torch code
    y2 = y1 + hh

    # single lane-dense output row: (x1,y1,x2,y2,obj,maxval, 0...)
    olane = lax.broadcasted_iota(jnp.int32, (1, out_ref.shape[2]), 1)
    out_ref[0] = (jnp.where(olane == 0, x1, 0.0)
                  + jnp.where(olane == 1, y1, 0.0)
                  + jnp.where(olane == 2, x2, 0.0)
                  + jnp.where(olane == 3, y2, 0.0)
                  + jnp.where(olane == 4, ob, 0.0)
                  + jnp.where(olane == 5, maxv, 0.0))


# ---------------------------------------------------------------------------
# Wrappers
# ---------------------------------------------------------------------------
def init_params(key):
    k1, k2, k3, k4 = jax.random.split(key, 4)
    return {
        # bf16 weights: native MXU input dtype, halves the weight DMA.
        # w_vs kept in torch (out,in) layout; w_ts stored pre-transposed (in,out).
        "w_vs": (0.02 * jax.random.normal(k1, (HID, VIS_DIM), jnp.float32)
                 ).astype(jnp.bfloat16),
        "b_vs": 0.02 * jax.random.normal(k2, (HID, 1), jnp.float32),
        "w_ts_t": (0.02 * jax.random.normal(k3, (HID, HID), jnp.float32)
                   ).astype(jnp.bfloat16),
        "b_ts": 0.02 * jax.random.normal(k4, (1, HID), jnp.float32),
    }


def net_forward(params, boxes_sml0, x_feat, flat_lang_feat):
    """Eval-time Net.forward starting from the encoder outputs.

    boxes_sml0     : (BS, GRIDNUM, ANCNUM, CH)   boxes_sml[0]
    x_feat         : (BS, VIS_DIM, H, W)         fused feature map x_[0] (NCHW)
    flat_lang_feat : (BS, HID)                   y_['flat_lang_feat']
    """
    # TODO(synk): visual_encoder / language_encoder / MultiScaleFusion backbones
    # have no provided source; their outputs are taken as inputs here.
    bs, gridnum, ancnum, ch = boxes_sml0.shape
    _, d, hh, ww = x_feat.shape

    # mean objectness per grid cell + top-k selection: tiny, stays in XLA as
    # one small fusion (top_k has no clean Pallas equivalent); everything
    # downstream is a single fused Pallas kernel.
    mean_obj = jnp.mean(boxes_sml0[..., 4], axis=2)                    # (bs, grid)
    _, indices = lax.top_k(mean_obj, SELECT_NUM)                       # (bs, k)
    indices = indices.astype(jnp.int32).reshape(bs, SELECT_NUM, 1)

    x_flat = x_feat.reshape(bs, d, gridnum)     # channel-major; free view
    y_in = flat_lang_feat.reshape(bs, 1, HID)
    boxes2d = boxes_sml0.reshape(bs, gridnum, ancnum * ch)   # free view

    out = pl.pallas_call(
        _fused_net_kernel,
        out_shape=jax.ShapeDtypeStruct((bs, 1, 128), jnp.float32),
        grid=(bs,),
        in_specs=[
            pl.BlockSpec((1, SELECT_NUM, 1), lambda b: (b, 0, 0)),      # indices
            pl.BlockSpec((1, d, gridnum), lambda b: (b, 0, 0)),         # x (C, HW)
            pl.BlockSpec((HID, d), lambda b: (0, 0)),                   # w_vs
            pl.BlockSpec((HID, 1), lambda b: (0, 0)),                   # b_vs
            pl.BlockSpec((1, 1, HID), lambda b: (b, 0, 0)),             # lang feat
            pl.BlockSpec((HID, HID), lambda b: (0, 0)),                 # w_ts (T)
            pl.BlockSpec((1, HID), lambda b: (0, 0)),                   # b_ts
            pl.BlockSpec((1, gridnum, ancnum * ch), lambda b: (b, 0, 0)),
        ],
        out_specs=pl.BlockSpec((1, 1, 128), lambda b: (b, 0, 0)),
        compiler_params=pltpu.CompilerParams(
            # bs=2 grid: keep it sequential on one TensorCore; avoids duplicated
            # weight DMA / cross-core sync when a parallel axis would be sharded.
            dimension_semantics=("arbitrary",)),
    )(indices, x_flat, params["w_vs"], params["b_vs"],
      y_in, params["w_ts_t"], params["b_ts"], boxes2d)

    box_pred = out[:, :, 0:5]            # (bs, 1, 5)  = (x1, y1, x2, y2, obj)
    maxval = out[:, 0, 5:6]              # (bs, 1)     = max head score
    mask_pred = None                     # masks_in_list is empty (detection path)
    return box_pred, mask_pred, maxval


if __name__ == "__main__":
    key = jax.random.PRNGKey(0)
    kp, k1, k2, k3 = jax.random.split(key, 4)
    params = init_params(kp)

    boxes_sml0 = jax.random.uniform(k1, (BS, GRIDNUM, ANCNUM, CH), jnp.float32)
    x_feat = jax.random.normal(k2, (BS, VIS_DIM, H, W), jnp.float32)
    flat_lang_feat = jax.random.normal(k3, (BS, HID), jnp.float32)

    box_pred, mask_pred, maxval = jax.jit(net_forward)(
        params, boxes_sml0, x_feat, flat_lang_feat)
    jax.block_until_ready((box_pred, maxval))

    assert box_pred.shape == (BS, 1, 5)
    assert maxval.shape == (BS, 1)
    assert mask_pred is None
    print("KERNEL_OK")
</pallas_src>

<mosaic_0001>
module attributes {stable_mosaic.version = 11 : i64} {
  func.func @_fused_net_kernel(%arg0: i32, %arg1: memref<1x16x1xi32, #tpu.memory_space<vmem>>, %arg2: memref<1x1024x64xf32, #tpu.memory_space<vmem>>, %arg3: memref<128x1024xbf16, #tpu.memory_space<vmem>>, %arg4: memref<128x1xf32, #tpu.memory_space<vmem>>, %arg5: memref<1x1x128xf32, #tpu.memory_space<vmem>>, %arg6: memref<128x128xbf16, #tpu.memory_space<vmem>>, %arg7: memref<1x128xf32, #tpu.memory_space<vmem>>, %arg8: memref<1x64x24xf32, #tpu.memory_space<vmem>>, %arg9: memref<1x1x128xf32, #tpu.memory_space<vmem>>) attributes {dimension_semantics = [#tpu.dimension_semantics<arbitrary>], iteration_bounds = array<i64: 2>, scalar_prefetch = 0 : i64, scratch_operands = 0 : i64, tpu.core_type = #tpu.core_type<tc>, window_params = [{transform_indices = @transform_0, window_bounds = array<i64: 1, 16, 1>}, {transform_indices = @transform_1, window_bounds = array<i64: 1, 1024, 64>}, {pipeline_mode = #tpu.pipeline_mode<synchronous>, transform_indices = @transform_2, window_bounds = array<i64: 128, 1024>}, {pipeline_mode = #tpu.pipeline_mode<synchronous>, transform_indices = @transform_3, window_bounds = array<i64: 128, 1>}, {transform_indices = @transform_4, window_bounds = array<i64: 1, 1, 128>}, {pipeline_mode = #tpu.pipeline_mode<synchronous>, transform_indices = @transform_5, window_bounds = array<i64: 128, 128>}, {pipeline_mode = #tpu.pipeline_mode<synchronous>, transform_indices = @transform_6, window_bounds = array<i64: 1, 128>}, {transform_indices = @transform_7, window_bounds = array<i64: 1, 64, 24>}, {transform_indices = @transform_8, window_bounds = array<i64: 1, 1, 128>}]} {
    %c0 = arith.constant 0 : index
    %c0_0 = arith.constant 0 : index
    %c0_1 = arith.constant 0 : index
    %0 = vector.load %arg2[%c0, %c0_0, %c0_1] : memref<1x1024x64xf32, #tpu.memory_space<vmem>>, vector<1x1024x64xf32>
    %1 = vector.shape_cast %0 : vector<1x1024x64xf32> to vector<1024x64xf32>
    %2 = arith.truncf %1 : vector<1024x64xf32> to vector<1024x64xbf16>
    %c0_2 = arith.constant 0 : index
    %c0_3 = arith.constant 0 : index
    %3 = vector.load %arg3[%c0_2, %c0_3] : memref<128x1024xbf16, #tpu.memory_space<vmem>>, vector<128x1024xbf16>
    %cst = arith.constant dense<0.000000e+00> : vector<128x64xf32>
    %4 = tpu.matmul %3, %2, %cst {dimension_numbers = #tpu.dot_dimension_numbers<[1], [0], [0], [1], [0, 0, 1, 1], [], []>} : vector<128x1024xbf16>, vector<1024x64xbf16>, vector<128x64xf32> -> vector<128x64xf32>
    %c0_4 = arith.constant 0 : index
    %c0_5 = arith.constant 0 : index
    %5 = vector.load %arg4[%c0_4, %c0_5] : memref<128x1xf32, #tpu.memory_space<vmem>>, vector<128x1xf32>
    %6 = vector.broadcast %5 : vector<128x1xf32> to vector<128x64xf32>
    %7 = arith.addf %4, %6 : vector<128x64xf32>
    %c0_6 = arith.constant 0 : index
    %c0_7 = arith.constant 0 : index
    %c0_8 = arith.constant 0 : index
    %8 = vector.load %arg5[%c0_6, %c0_7, %c0_8] : memref<1x1x128xf32, #tpu.memory_space<vmem>>, vector<1x1x128xf32>
    %9 = vector.shape_cast %8 : vector<1x1x128xf32> to vector<1x128xf32>
    %10 = arith.truncf %9 : vector<1x128xf32> to vector<1x128xbf16>
    %c0_9 = arith.constant 0 : index
    %c0_10 = arith.constant 0 : index
    %11 = vector.load %arg6[%c0_9, %c0_10] : memref<128x128xbf16, #tpu.memory_space<vmem>>, vector<128x128xbf16>
    %cst_11 = arith.constant dense<0.000000e+00> : vector<1x128xf32>
    %12 = tpu.matmul %10, %11, %cst_11 {dimension_numbers = #tpu.dot_dimension_numbers<[1], [0], [0], [1], [0, 0, 1, 1], [], []>} : vector<1x128xbf16>, vector<128x128xbf16>, vector<1x128xf32> -> vector<1x128xf32>
    %c0_12 = arith.constant 0 : index
    %c0_13 = arith.constant 0 : index
    %13 = vector.load %arg7[%c0_12, %c0_13] : memref<1x128xf32, #tpu.memory_space<vmem>>, vector<1x128xf32>
    %14 = arith.addf %12, %13 : vector<1x128xf32>
    %15 = arith.mulf %7, %7 : vector<128x64xf32>
    %cst_14 = arith.constant dense<0.000000e+00> : vector<64xf32>
    %16 = vector.multi_reduction <add>, %15, %cst_14 [0] : vector<128x64xf32> to vector<64xf32>
    %17 = vector.shape_cast %16 : vector<64xf32> to vector<1x64xf32>
    %cst_15 = arith.constant 9.99999997E-7 : f32
    %18 = vector.broadcast %cst_15 : f32 to vector<1x64xf32>
    %19 = arith.addf %17, %18 : vector<1x64xf32>
    %20 = math.rsqrt %19 : vector<1x64xf32>
    %21 = arith.mulf %14, %14 : vector<1x128xf32>
    %cst_16 = arith.constant dense<0.000000e+00> : vector<1xf32>
    %22 = vector.multi_reduction <add>, %21, %cst_16 [1] : vector<1x128xf32> to vector<1xf32>
    %23 = vector.shape_cast %22 : vector<1xf32> to vector<1x1xf32>
    %cst_17 = arith.constant 9.99999997E-7 : f32
    %24 = vector.broadcast %cst_17 : f32 to vector<1x1xf32>
    %25 = arith.addf %23, %24 : vector<1x1xf32>
    %26 = math.rsqrt %25 : vector<1x1xf32>
    %cst_18 = arith.constant dense<0.000000e+00> : vector<1x64xf32>
    %27 = tpu.matmul %14, %7, %cst_18 {dimension_numbers = #tpu.dot_dimension_numbers<[1], [0], [0], [1], [0, 0, 1, 1], [], []>} : vector<1x128xf32>, vector<128x64xf32>, vector<1x64xf32> -> vector<1x64xf32>
    %28 = arith.mulf %27, %20 : vector<1x64xf32>
    %29 = vector.broadcast %26 : vector<1x1xf32> to vector<1x64xf32>
    %30 = arith.mulf %28, %29 : vector<1x64xf32>
    %c0_19 = arith.constant 0 : index
    %c0_20 = arith.constant 0 : index
    %c0_21 = arith.constant 0 : index
    %31 = vector.load %arg1[%c0_19, %c0_20, %c0_21] : memref<1x16x1xi32, #tpu.memory_space<vmem>>, vector<1x16x1xi32>
    %32 = vector.shape_cast %31 : vector<1x16x1xi32> to vector<16x1xi32>
    %33 = tpu.iota {dimensions = array<i32: 1>} : vector<16x64xi32>
    %34 = vector.broadcast %32 : vector<16x1xi32> to vector<16x64xi32>
    %35 = arith.cmpi eq, %33, %34 : vector<16x64xi32>
    %36 = arith.extui %35 : vector<16x64xi1> to vector<16x64xi32>
    %37 = arith.sitofp %36 : vector<16x64xi32> to vector<16x64xf32>
    %cst_22 = arith.constant dense<0xFF800000> : vector<64xf32>
    %38 = vector.multi_reduction <maximumf>, %37, %cst_22 [0] : vector<16x64xf32> to vector<64xf32>
    %39 = vector.shape_cast %38 : vector<64xf32> to vector<1x64xf32>
    %cst_23 = arith.constant 5.000000e-01 : f32
    %40 = vector.broadcast %cst_23 : f32 to vector<1x64xf32>
    %41 = arith.cmpf ogt, %39, %40 : vector<1x64xf32>
    %cst_24 = arith.constant -1.000000e+30 : f32
    %42 = vector.broadcast %cst_24 : f32 to vector<1x64xf32>
    %43 = arith.select %41, %30, %42 : vector<1x64xi1>, vector<1x64xf32>
    %cst_25 = arith.constant dense<0xFF800000> : vector<1xf32>
    %44 = vector.multi_reduction <maximumf>, %43, %cst_25 [1] : vector<1x64xf32> to vector<1xf32>
    %45 = vector.shape_cast %44 : vector<1xf32> to vector<1x1xf32>
    %46 = tpu.iota {dimensions = array<i32: 1>} : vector<1x64xi32>
    %47 = vector.broadcast %45 : vector<1x1xf32> to vector<1x64xf32>
    %48 = arith.cmpf oge, %43, %47 : vector<1x64xf32>
    %c64_i32 = arith.constant 64 : i32
    %49 = vector.broadcast %c64_i32 : i32 to vector<1x64xi32>
    %50 = arith.select %48, %46, %49 : vector<1x64xi1>, vector<1x64xi32>
    %cst_26 = arith.constant dense<2147483647> : vector<1xi32>
    %51 = vector.multi_reduction <minsi>, %50, %cst_26 [1] : vector<1x64xi32> to vector<1xi32>
    %52 = vector.shape_cast %51 : vector<1xi32> to vector<1x1xi32>
    %53 = tpu.iota {dimensions = array<i32: 0>} : vector<64x1xi32>
    %54 = vector.broadcast %52 : vector<1x1xi32> to vector<64x1xi32>
    %55 = arith.cmpi eq, %53, %54 : vector<64x1xi32>
    %56 = arith.extui %55 : vector<64x1xi1> to vector<64x1xi32>
    %57 = arith.sitofp %56 : vector<64x1xi32> to vector<64x1xf32>
    %c0_27 = arith.constant 0 : index
    %c0_28 = arith.constant 0 : index
    %c0_29 = arith.constant 0 : index
    %58 = vector.load %arg8[%c0_27, %c0_28, %c0_29] : memref<1x64x24xf32, #tpu.memory_space<vmem>>, vector<1x64x24xf32>
    %59 = vector.shape_cast %58 : vector<1x64x24xf32> to vector<64x24xf32>
    %60 = vector.broadcast %57 : vector<64x1xf32> to vector<64x24xf32>
    %61 = arith.mulf %59, %60 : vector<64x24xf32>
    %cst_30 = arith.constant dense<0.000000e+00> : vector<24xf32>
    %62 = vector.multi_reduction <add>, %61, %cst_30 [0] : vector<64x24xf32> to vector<24xf32>
    %63 = vector.shape_cast %62 : vector<24xf32> to vector<1x24xf32>
    %64 = tpu.iota {dimensions = array<i32: 1>} : vector<1x24xi32>
    %c8_i32 = arith.constant 8 : i32
    %c0_i32 = arith.constant 0 : i32
    %65 = arith.cmpi eq, %c8_i32, %c0_i32 : i32
    %c1_i32 = arith.constant 1 : i32
    %66 = arith.select %65, %c1_i32, %c8_i32 : i32
    %67 = vector.broadcast %66 : i32 to vector<1x24xi32>
    %68 = arith.remsi %64, %67 : vector<1x24xi32>
    %c0_i32_31 = arith.constant 0 : i32
    %69 = vector.broadcast %c0_i32_31 : i32 to vector<1x24xi32>
    %70 = arith.cmpi ne, %68, %69 : vector<1x24xi32>
    %c0_i32_32 = arith.constant 0 : i32
    %71 = vector.broadcast %c0_i32_32 : i32 to vector<1x24xi32>
    %72 = arith.cmpi slt, %68, %71 : vector<1x24xi32>
    %c0_i32_33 = arith.constant 0 : i32
    %73 = arith.cmpi slt, %66, %c0_i32_33 : i32
    %74 = vector.broadcast %73 : i1 to vector<1x24xi1>
    %75 = vector.broadcast %74 : vector<1x24xi1> to vector<1x24xi1>
    %76 = arith.xori %72, %75 : vector<1x24xi1>
    %77 = arith.andi %76, %70 : vector<1x24xi1>
    %78 = vector.broadcast %66 : i32 to vector<1x24xi32>
    %79 = arith.addi %68, %78 : vector<1x24xi32>
    %80 = arith.select %77, %79, %68 : vector<1x24xi1>, vector<1x24xi32>
    %c4_i32 = arith.constant 4 : i32
    %81 = vector.broadcast %c4_i32 : i32 to vector<1x24xi32>
    %82 = arith.cmpi eq, %80, %81 : vector<1x24xi32>
    %cst_34 = arith.constant -1.000000e+30 : f32
    %83 = vector.broadcast %cst_34 : f32 to vector<1x24xf32>
    %84 = arith.select %82, %63, %83 : vector<1x24xi1>, vector<1x24xf32>
    %cst_35 = arith.constant dense<0xFF800000> : vector<1xf32>
    %85 = vector.multi_reduction <maximumf>, %84, %cst_35 [1] : vector<1x24xf32> to vector<1xf32>
    %86 = vector.shape_cast %85 : vector<1xf32> to vector<1x1xf32>
    %87 = vector.broadcast %86 : vector<1x1xf32> to vector<1x24xf32>
    %88 = arith.cmpf oge, %63, %87 : vector<1x24xf32>
    %89 = arith.andi %82, %88 : vector<1x24xi1>
    %c24_i32 = arith.constant 24 : i32
    %90 = vector.broadcast %c24_i32 : i32 to vector<1x24xi32>
    %91 = arith.select %89, %64, %90 : vector<1x24xi1>, vector<1x24xi32>
    %cst_36 = arith.constant dense<2147483647> : vector<1xi32>
    %92 = vector.multi_reduction <minsi>, %91, %cst_36 [1] : vector<1x24xi32> to vector<1xi32>
    %93 = vector.shape_cast %92 : vector<1xi32> to vector<1x1xi32>
    %c4_i32_37 = arith.constant 4 : i32
    %94 = vector.broadcast %c4_i32_37 : i32 to vector<1x1xi32>
    %95 = arith.subi %93, %94 : vector<1x1xi32>
    %96 = vector.broadcast %95 : vector<1x1xi32> to vector<1x24xi32>
    %97 = arith.cmpi sge, %64, %96 : vector<1x24xi32>
    %c8_i32_38 = arith.constant 8 : i32
    %98 = vector.broadcast %c8_i32_38 : i32 to vector<1x1xi32>
    %99 = arith.addi %95, %98 : vector<1x1xi32>
    %100 = vector.broadcast %99 : vector<1x1xi32> to vector<1x24xi32>
    %101 = arith.cmpi slt, %64, %100 : vector<1x24xi32>
    %102 = arith.andi %97, %101 : vector<1x24xi1>
    %c0_i32_39 = arith.constant 0 : i32
    %103 = vector.broadcast %c0_i32_39 : i32 to vector<1x24xi32>
    %104 = arith.cmpi eq, %80, %103 : vector<1x24xi32>
    %105 = arith.andi %102, %104 : vector<1x24xi1>
    %cst_40 = arith.constant 0.000000e+00 : f32
    %106 = vector.broadcast %cst_40 : f32 to vector<1x24xf32>
    %107 = arith.select %105, %63, %106 : vector<1x24xi1>, vector<1x24xf32>
    %cst_41 = arith.constant dense<0.000000e+00> : vector<1xf32>
    %108 = vector.multi_reduction <add>, %107, %cst_41 [1] : vector<1x24xf32> to vector<1xf32>
    %109 = vector.shape_cast %108 : vector<1xf32> to vector<1x1xf32>
    %c1_i32_42 = arith.constant 1 : i32
    %110 = vector.broadcast %c1_i32_42 : i32 to vector<1x24xi32>
    %111 = arith.cmpi eq, %80, %110 : vector<1x24xi32>
    %112 = arith.andi %102, %111 : vector<1x24xi1>
    %cst_43 = arith.constant 0.000000e+00 : f32
    %113 = vector.broadcast %cst_43 : f32 to vector<1x24xf32>
    %114 = arith.select %112, %63, %113 : vector<1x24xi1>, vector<1x24xf32>
    %cst_44 = arith.constant dense<0.000000e+00> : vector<1xf32>
    %115 = vector.multi_reduction <add>, %114, %cst_44 [1] : vector<1x24xf32> to vector<1xf32>
    %116 = vector.shape_cast %115 : vector<1xf32> to vector<1x1xf32>
    %c2_i32 = arith.constant 2 : i32
    %117 = vector.broadcast %c2_i32 : i32 to vector<1x24xi32>
    %118 = arith.cmpi eq, %80, %117 : vector<1x24xi32>
    %119 = arith.andi %102, %118 : vector<1x24xi1>
    %cst_45 = arith.constant 0.000000e+00 : f32
    %120 = vector.broadcast %cst_45 : f32 to vector<1x24xf32>
    %121 = arith.select %119, %63, %120 : vector<1x24xi1>, vector<1x24xf32>
    %cst_46 = arith.constant dense<0.000000e+00> : vector<1xf32>
    %122 = vector.multi_reduction <add>, %121, %cst_46 [1] : vector<1x24xf32> to vector<1xf32>
    %123 = vector.shape_cast %122 : vector<1xf32> to vector<1x1xf32>
    %c3_i32 = arith.constant 3 : i32
    %124 = vector.broadcast %c3_i32 : i32 to vector<1x24xi32>
    %125 = arith.cmpi eq, %80, %124 : vector<1x24xi32>
    %126 = arith.andi %102, %125 : vector<1x24xi1>
    %cst_47 = arith.constant 0.000000e+00 : f32
    %127 = vector.broadcast %cst_47 : f32 to vector<1x24xf32>
    %128 = arith.select %126, %63, %127 : vector<1x24xi1>, vector<1x24xf32>
    %cst_48 = arith.constant dense<0.000000e+00> : vector<1xf32>
    %129 = vector.multi_reduction <add>, %128, %cst_48 [1] : vector<1x24xf32> to vector<1xf32>
    %130 = vector.shape_cast %129 : vector<1xf32> to vector<1x1xf32>
    %c4_i32_49 = arith.constant 4 : i32
    %131 = vector.broadcast %c4_i32_49 : i32 to vector<1x24xi32>
    %132 = arith.cmpi eq, %80, %131 : vector<1x24xi32>
    %133 = arith.andi %102, %132 : vector<1x24xi1>
    %cst_50 = arith.constant 0.000000e+00 : f32
    %134 = vector.broadcast %cst_50 : f32 to vector<1x24xf32>
    %135 = arith.select %133, %63, %134 : vector<1x24xi1>, vector<1x24xf32>
    %cst_51 = arith.constant dense<0.000000e+00> : vector<1xf32>
    %136 = vector.multi_reduction <add>, %135, %cst_51 [1] : vector<1x24xf32> to vector<1xf32>
    %137 = vector.shape_cast %136 : vector<1xf32> to vector<1x1xf32>
    %cst_52 = arith.constant 5.000000e-01 : f32
    %138 = vector.broadcast %cst_52 : f32 to vector<1x1xf32>
    %139 = arith.mulf %123, %138 : vector<1x1xf32>
    %140 = arith.subf %109, %139 : vector<1x1xf32>
    %cst_53 = arith.constant 5.000000e-01 : f32
    %141 = vector.broadcast %cst_53 : f32 to vector<1x1xf32>
    %142 = arith.mulf %130, %141 : vector<1x1xf32>
    %143 = arith.subf %116, %142 : vector<1x1xf32>
    %144 = arith.addf %140, %123 : vector<1x1xf32>
    %145 = arith.addf %143, %130 : vector<1x1xf32>
    %146 = tpu.iota {dimensions = array<i32: 1>} : vector<1x128xi32>
    %c0_i32_54 = arith.constant 0 : i32
    %147 = vector.broadcast %c0_i32_54 : i32 to vector<1x128xi32>
    %148 = arith.cmpi eq, %146, %147 : vector<1x128xi32>
    %cst_55 = arith.constant 0.000000e+00 : f32
    %149 = vector.shape_cast %140 : vector<1x1xf32> to vector<1x1xf32>
    %150 = vector.broadcast %149 : vector<1x1xf32> to vector<1x128xf32>
    %151 = vector.broadcast %cst_55 : f32 to vector<1x128xf32>
    %152 = arith.select %148, %150, %151 : vector<1x128xi1>, vector<1x128xf32>
    %c1_i32_56 = arith.constant 1 : i32
    %153 = vector.broadcast %c1_i32_56 : i32 to vector<1x128xi32>
    %154 = arith.cmpi eq, %146, %153 : vector<1x128xi32>
    %cst_57 = arith.constant 0.000000e+00 : f32
    %155 = vector.shape_cast %143 : vector<1x1xf32> to vector<1x1xf32>
    %156 = vector.broadcast %155 : vector<1x1xf32> to vector<1x128xf32>
    %157 = vector.broadcast %cst_57 : f32 to vector<1x128xf32>
    %158 = arith.select %154, %156, %157 : vector<1x128xi1>, vector<1x128xf32>
    %159 = arith.addf %152, %158 : vector<1x128xf32>
    %c2_i32_58 = arith.constant 2 : i32
    %160 = vector.broadcast %c2_i32_58 : i32 to vector<1x128xi32>
    %161 = arith.cmpi eq, %146, %160 : vector<1x128xi32>
    %cst_59 = arith.constant 0.000000e+00 : f32
    %162 = vector.shape_cast %144 : vector<1x1xf32> to vector<1x1xf32>
    %163 = vector.broadcast %162 : vector<1x1xf32> to vector<1x128xf32>
    %164 = vector.broadcast %cst_59 : f32 to vector<1x128xf32>
    %165 = arith.select %161, %163, %164 : vector<1x128xi1>, vector<1x128xf32>
    %166 = arith.addf %159, %165 : vector<1x128xf32>
    %c3_i32_60 = arith.constant 3 : i32
    %167 = vector.broadcast %c3_i32_60 : i32 to vector<1x128xi32>
    %168 = arith.cmpi eq, %146, %167 : vector<1x128xi32>
    %cst_61 = arith.constant 0.000000e+00 : f32
    %169 = vector.shape_cast %145 : vector<1x1xf32> to vector<1x1xf32>
    %170 = vector.broadcast %169 : vector<1x1xf32> to vector<1x128xf32>
    %171 = vector.broadcast %cst_61 : f32 to vector<1x128xf32>
    %172 = arith.select %168, %170, %171 : vector<1x128xi1>, vector<1x128xf32>
    %173 = arith.addf %166, %172 : vector<1x128xf32>
    %c4_i32_62 = arith.constant 4 : i32
    %174 = vector.broadcast %c4_i32_62 : i32 to vector<1x128xi32>
    %175 = arith.cmpi eq, %146, %174 : vector<1x128xi32>
    %cst_63 = arith.constant 0.000000e+00 : f32
    %176 = vector.shape_cast %137 : vector<1x1xf32> to vector<1x1xf32>
    %177 = vector.broadcast %176 : vector<1x1xf32> to vector<1x128xf32>
    %178 = vector.broadcast %cst_63 : f32 to vector<1x128xf32>
    %179 = arith.select %175, %177, %178 : vector<1x128xi1>, vector<1x128xf32>
    %180 = arith.addf %173, %179 : vector<1x128xf32>
    %c5_i32 = arith.constant 5 : i32
    %181 = vector.broadcast %c5_i32 : i32 to vector<1x128xi32>
    %182 = arith.cmpi eq, %146, %181 : vector<1x128xi32>
    %cst_64 = arith.constant 0.000000e+00 : f32
    %183 = vector.shape_cast %45 : vector<1x1xf32> to vector<1x1xf32>
    %184 = vector.broadcast %183 : vector<1x1xf32> to vector<1x128xf32>
    %185 = vector.broadcast %cst_64 : f32 to vector<1x128xf32>
    %186 = arith.select %182, %184, %185 : vector<1x128xi1>, vector<1x128xf32>
    %187 = arith.addf %180, %186 : vector<1x128xf32>
    %c0_65 = arith.constant 0 : index
    %c0_66 = arith.constant 0 : index
    %c0_67 = arith.constant 0 : index
    %188 = vector.load %arg9[%c0_65, %c0_66, %c0_67] : memref<1x1x128xf32, #tpu.memory_space<vmem>>, vector<1x1x128xf32>
    %189 = vector.shape_cast %188 : vector<1x1x128xf32> to vector<1x128xf32>
    %190 = vector.shape_cast %187 : vector<1x128xf32> to vector<1x1x128xf32>
    tpu.vector_store %arg9[%c0_65, %c0_66, %c0_67], %190 {strides = array<i32>} : memref<1x1x128xf32, #tpu.memory_space<vmem>>, vector<1x1x128xf32>,
    return
  }
  func.func @transform_0(%arg0: i32) -> (i32, i32, i32) {
    %c0_i32 = arith.constant 0 : i32
    %c0_i32_0 = arith.constant 0 : i32
    %c0_i32_1 = arith.constant 0 : i32
    return %arg0, %c0_i32, %c0_i32_0 : i32, i32, i32
  }
  func.func @transform_1(%arg0: i32) -> (i32, i32, i32) {
    %c0_i32 = arith.constant 0 : i32
    %c0_i32_0 = arith.constant 0 : i32
    %c0_i32_1 = arith.constant 0 : i32
    return %arg0, %c0_i32, %c0_i32_0 : i32, i32, i32
  }
  func.func @transform_2(%arg0: i32) -> (i32, i32) {
    %c0_i32 = arith.constant 0 : i32
    %c0_i32_0 = arith.constant 0 : i32
    %c0_i32_1 = arith.constant 0 : i32
    return %c0_i32, %c0_i32_0 : i32, i32
  }
  func.func @transform_3(%arg0: i32) -> (i32, i32) {
    %c0_i32 = arith.constant 0 : i32
    %c0_i32_0 = arith.constant 0 : i32
    %c0_i32_1 = arith.constant 0 : i32
    return %c0_i32, %c0_i32_0 : i32, i32
  }
  func.func @transform_4(%arg0: i32) -> (i32, i32, i32) {
    %c0_i32 = arith.constant 0 : i32
    %c0_i32_0 = arith.constant 0 : i32
    %c0_i32_1 = arith.constant 0 : i32
    return %arg0, %c0_i32, %c0_i32_0 : i32, i32, i32
  }
  func.func @transform_5(%arg0: i32) -> (i32, i32) {
    %c0_i32 = arith.constant 0 : i32
    %c0_i32_0 = arith.constant 0 : i32
    %c0_i32_1 = arith.constant 0 : i32
    return %c0_i32, %c0_i32_0 : i32, i32
  }
  func.func @transform_6(%arg0: i32) -> (i32, i32) {
    %c0_i32 = arith.constant 0 : i32
    %c0_i32_0 = arith.constant 0 : i32
    %c0_i32_1 = arith.constant 0 : i32
    return %c0_i32, %c0_i32_0 : i32, i32
  }
  func.func @transform_7(%arg0: i32) -> (i32, i32, i32) {
    %c0_i32 = arith.constant 0 : i32
    %c0_i32_0 = arith.constant 0 : i32
    %c0_i32_1 = arith.constant 0 : i32
    return %arg0, %c0_i32, %c0_i32_0 : i32, i32, i32
  }
  func.func @transform_8(%arg0: i32) -> (i32, i32, i32) {
    %c0_i32 = arith.constant 0 : i32
    %c0_i32_0 = arith.constant 0 : i32
    %c0_i32_1 = arith.constant 0 : i32
    return %arg0, %c0_i32, %c0_i32_0 : i32, i32, i32
  }
}

</mosaic_0001>

<bundles_post_ra>
// kernel: net_forward.1
= control target key start
LH: loop header
LB: loop body
LE: loop exit
PB: predicated region body
PF: predicated region fallthrough
CT: control target
= control target key end

     0   :  { %s2498_s27 = smov 0   ;;  %s3163_s0 = inlined_call_operand.vmem [shape: s32[2,16,1], index: 0, kind: input, shape index: {}]   ;;  %s3164_s1 = inlined_call_operand.vmem [shape: f32[2,1024,64], index: 1, kind: input, shape index: {}]   ;;  %s3165_s2 = inlined_call_operand.vmem [shape: bf16[128,1024], index: 2, kind: input, shape index: {}]   ;;  %s3166_s3 = inlined_call_operand.vmem [shape: f32[128,1], index: 3, kind: input, shape index: {}]   ;;  %s3167_s4 = inlined_call_operand.vmem [shape: f32[2,1,128], index: 4, kind: input, shape index: {}]   ;;  %s3168_s5 = inlined_call_operand.vmem [shape: bf16[128,128], index: 5, kind: input, shape index: {}]   ;;  %s3169_s6 = inlined_call_operand.vmem [shape: f32[1,128], index: 6, kind: input, shape index: {}]   ;;  %s3170_s7 = inlined_call_operand.vmem [shape: f32[2,64,24], index: 7, kind: input, shape index: {}]   ;;  %s3171_s8 = inlined_call_operand.vmem [shape: f32[2,1,128], index: 8, kind: output, shape index: {}]  }
   0x1 LB: > { %s1955_s28 = sadd.s32 4294967295, %s2447_s27   ;;  %p1959_p0 = scmp.ge.s32.totalorder %s2447_s27, 1  ;;  %s2447_s27 = sphi %s2498_s27, %s18_s27  }
   0x2   : > { %p290_p1 = scmp.lt.s32.totalorder %s2447_s27, 3 }
   0x4   : > { %p291_p2 = pnand %p1959_p0, %p290_p1 }
   0x5   : > { %p335_p3 = scmp.lt.s32.totalorder (!%p291_p2), %s1955_s28, 1  ;;  %v2509_v0 = vld [vmem:[%s3165_s2] sm:$0xff] (!%p291_p2)  ;;  %v2519_v2 = vld [vmem:[%s3165_s2 + $0x8] sm:$0xff] (!%p291_p2)  ;;  %v2449_v5 = vmov (!%p291_p2), 0   ;;  %vm2451_vm0 = vmmov (!%p291_p2), 0   ;;  %vm1540_vm1 = vcmask (!%p291_p2), 523264  }
   0x6   : > { %294 = sbr.rel (%p291_p2) target bundleno = 1700 (0x6a4), region = 52  ;;  %v2514_v1 = vld [vmem:[%s3165_s2 + $0x20] sm:$0xff] (!%p291_p2)  ;;  %v2526_v4 = vld [vmem:[%s3165_s2 + $0x28] sm:$0xff] (!%p291_p2)  ;;  %2427 = vset.pattern.permute.xlu0 (!%p291_p2), %v2449_v5  ;;  %2428 = vset.pattern.permute.xlu1 (!%p291_p2), %v2449_v5  ;;  %vm1581_vm2 = vcmask (!%p291_p2), 1040384   ;;  %vm1686_vm5 = vcmask (!%p291_p2), 516096   ;;  %vm1760_vm13 = vcmask (!%p291_p2), 195584  }
   0x7   : > { %v1967_v3 = vcombine.high (!%p291_p2), %v2509_v0, %v2514_v1  ;;  %v1969_v6 = vcombine.high (!%p291_p2), %v2519_v2, %v2526_v4 }
   0x9   : > { %1061 = vmatprep.mubr.bf16.mxu0 (!%p291_p2), %v1967_v3  ;;  %1158 = vmatprep.mubr.bf16.mxu1 (!%p291_p2), %v1969_v6 }
   0xd   : > { %s3175_s28 = smov (!%p335_p3, %s1955_s28), 1 }
   0xe   : > { %s2052_s15 = sshll.u32 %s3175_s28, 10  ;;  %s2051_s26 = sshll.u32 %s3175_s28, 4 }
   0xf   : > { %s2536_s18 = scalar_lea.vmem %s3164_s1, %s2052_s15  ;;  %s339_s20 = scalar_lea.vmem %s3163_s0, %s2051_s26 }
  0x10   : > { %v373_v7 = vld [vmem:[%s2536_s18 + $0x80] sm:$0xff]  ;;  %v374_v8 = vld [vmem:[%s2536_s18 + $0x88] sm:$0xff]  ;;  %v375_v18 = vld [vmem:[%s2536_s18 + $0x90] sm:$0xff]  ;;  %s347_s14 = scalar_lea.vmem %s3167_s4, %s3175_s28  ;;  %s2053_s17 = sshll.u32 %s3175_s28, 6 }
  0x11   : > { %v405_v9 = vld [vmem:[%s2536_s18 + $0x180] sm:$0xff]  ;;  %v493_v10 = vpack.c.bf16 %v374_v8, %v373_v7  ;;  %v406_v11 = vld [vmem:[%s2536_s18 + $0x188] sm:$0xff]  ;;  %v376_v20 = vld [vmem:[%s2536_s18 + $0x98] sm:$0xff]  ;;  %s3095_s21 = scalar_lea.vmem %s3170_s7, %s2053_s17  ;;  %s355_s24 = scalar_lea.vmem %s3171_s8, %s3175_s28 }
  0x12   : > { %v357_v12 = vld [vmem:[%s2536_s18] sm:$0xff]  ;;  %v358_v13 = vld [vmem:[%s2536_s18 + $0x8] sm:$0xff]  ;;  %v509_v14 = vpack.c.bf16 %v406_v11, %v405_v9  ;;  %v407_v21 = vld [vmem:[%s2536_s18 + $0x190] sm:$0xff]  ;;  %v494_v23 = vpack.c.bf16 %v376_v20, %v375_v18 }
  0x13   : > { %v485_v15 = vpack.c.bf16 %v358_v13, %v357_v12  ;;  %v389_v16 = vld [vmem:[%s2536_s18 + $0x100] sm:$0xff]  ;;  %v390_v17 = vld [vmem:[%s2536_s18 + $0x108] sm:$0xff]  ;;  %2054 = vmatprep.subr.bf16.mxu0 %v493_v10  ;;  %v408_v22 = vld [vmem:[%s2536_s18 + $0x198] sm:$0xff] }
  0x14   : > { %v501_v19 = vpack.c.bf16 %v390_v17, %v389_v16  ;;  %2118 = vmatprep.subr.bf16.mxu1 %v509_v14  ;;  %v510_v24 = vpack.c.bf16 %v408_v22, %v407_v21  ;;  %v359_v25 = vld [vmem:[%s2536_s18 + $0x10] sm:$0xff]  ;;  %v360_v26 = vld [vmem:[%s2536_s18 + $0x18] sm:$0xff]  ;;  %v377_v30 = vld [vmem:[%s2536_s18 + $0xa0] sm:$0xff] }
  0x15   : > { %2055 = vmatpush3.bf16.msra.mxu0 %v485_v15  ;;  %v391_v27 = vld [vmem:[%s2536_s18 + $0x110] sm:$0xff]  ;;  %v486_v28 = vpack.c.bf16 %v360_v26, %v359_v25  ;;  %v392_v29 = vld [vmem:[%s2536_s18 + $0x118] sm:$0xff]  ;;  %v378_v31 = vld [vmem:[%s2536_s18 + $0xa8] sm:$0xff] }
  0x16   : > { %2119 = vmatpush3.bf16.msra.mxu1 %v501_v19  ;;  %2056 = vmatprep.subr.bf16.mxu0 %v494_v23  ;;  %v502_v32 = vpack.c.bf16 %v392_v29, %v391_v27  ;;  %v495_v33 = vpack.c.bf16 %v378_v31, %v377_v30  ;;  %v409_v34 = vld [vmem:[%s2536_s18 + $0x1a0] sm:$0xff]  ;;  %v410_v35 = vld [vmem:[%s2536_s18 + $0x1a8] sm:$0xff]  ;;  %v379_v42 = vld [vmem:[%s2536_s18 + $0xb0] sm:$0xff] }
  0x17   : > { %2120 = vmatprep.subr.bf16.mxu1 %v510_v24  ;;  %v361_v36 = vld [vmem:[%s2536_s18 + $0x20] sm:$0xff]  ;;  %v511_v37 = vpack.c.bf16 %v410_v35, %v409_v34  ;;  %v362_v38 = vld [vmem:[%s2536_s18 + $0x28] sm:$0xff]  ;;  %v380_v43 = vld [vmem:[%s2536_s18 + $0xb8] sm:$0xff] }
  0x18   : > { %v393_v39 = vld [vmem:[%s2536_s18 + $0x120] sm:$0xff]  ;;  %v394_v40 = vld [vmem:[%s2536_s18 + $0x128] sm:$0xff]  ;;  %v487_v41 = vpack.c.bf16 %v362_v38, %v361_v36  ;;  %v411_v44 = vld [vmem:[%s2536_s18 + $0x1b0] sm:$0xff]  ;;  %v496_v46 = vpack.c.bf16 %v380_v43, %v379_v42 }
  0x19   : > { %2057 = vmatpush3.bf16.msra.mxu0 %v486_v28  ;;  %v503_v45 = vpack.c.bf16 %v394_v40, %v393_v39  ;;  %v412_v47 = vld [vmem:[%s2536_s18 + $0x1b8] sm:$0xff]  ;;  %v363_v48 = vld [vmem:[%s2536_s18 + $0x30] sm:$0xff]  ;;  %v381_v53 = vld [vmem:[%s2536_s18 + $0xc0] sm:$0xff] }
  0x1a   : > { %2121 = vmatpush3.bf16.msra.mxu1 %v502_v32  ;;  %2058 = vmatprep.subr.bf16.mxu0 %v495_v33  ;;  %v364_v49 = vld [vmem:[%s2536_s18 + $0x38] sm:$0xff]  ;;  %v512_v50 = vpack.c.bf16 %v412_v47, %v411_v44  ;;  %v395_v51 = vld [vmem:[%s2536_s18 + $0x130] sm:$0xff]  ;;  %v382_v54 = vld [vmem:[%s2536_s18 + $0xc8] sm:$0xff] }
  0x1b   : > { %2122 = vmatprep.subr.bf16.mxu1 %v511_v37  ;;  %v396_v52 = vld [vmem:[%s2536_s18 + $0x138] sm:$0xff]  ;;  %v413_v55 = vld [vmem:[%s2536_s18 + $0x1c0] sm:$0xff]  ;;  %v414_v56 = vld [vmem:[%s2536_s18 + $0x1c8] sm:$0xff]  ;;  %v488_v57 = vpack.c.bf16 %v364_v49, %v363_v48  ;;  %v497_v59 = vpack.c.bf16 %v382_v54, %v381_v53 }
  0x1c   : > { %v504_v58 = vpack.c.bf16 %v396_v52, %v395_v51  ;;  %v365_v60 = vld [vmem:[%s2536_s18 + $0x40] sm:$0xff]  ;;  %v366_v61 = vld [vmem:[%s2536_s18 + $0x48] sm:$0xff]  ;;  %v513_v63 = vpack.c.bf16 %v414_v56, %v413_v55  ;;  %v383_v5 = vld [vmem:[%s2536_s18 + $0xd0] sm:$0xff]  ;;  %v1966_v56 = vcombine.low %v2509_v0, %v2514_v1 }
  0x1d   : > { %2059 = vmatpush3.bf16.msra.mxu0 %v487_v41  ;;  %v397_v62 = vld [vmem:[%s2536_s18 + $0x140] sm:$0xff]  ;;  %v398_v3 = vld [vmem:[%s2536_s18 + $0x148] sm:$0xff]  ;;  %v384_v6 = vld [vmem:[%s2536_s18 + $0xd8] sm:$0xff]  ;;  %v489_v9 = vpack.c.bf16 %v366_v61, %v365_v60  ;;  %v1968_v60 = vcombine.low %v2519_v2, %v2526_v4 }
  0x1e   : > { %2123 = vmatpush3.bf16.msra.mxu1 %v503_v45  ;;  %2060 = vmatprep.subr.bf16.mxu0 %v496_v46  ;;  %v415_v7 = vld [vmem:[%s2536_s18 + $0x1d0] sm:$0xff]  ;;  %v416_v8 = vld [vmem:[%s2536_s18 + $0x1d8] sm:$0xff]  ;;  %v505_v10 = vpack.c.bf16 %v398_v3, %v397_v62  ;;  %v498_v11 = vpack.c.bf16 %v384_v6, %v383_v5  ;;  %v385_v17 = vld [vmem:[%s2536_s18 + $0xe0] sm:$0xff] }
  0x1f   : > { %2124 = vmatprep.subr.bf16.mxu1 %v512_v50  ;;  %v367_v12 = vld [vmem:[%s2536_s18 + $0x50] sm:$0xff]  ;;  %v368_v13 = vld [vmem:[%s2536_s18 + $0x58] sm:$0xff]  ;;  %v514_v15 = vpack.c.bf16 %v416_v8, %v415_v7  ;;  %v386_v18 = vld [vmem:[%s2536_s18 + $0xe8] sm:$0xff] }
  0x20   : > { %v399_v14 = vld [vmem:[%s2536_s18 + $0x150] sm:$0xff]  ;;  %v400_v16 = vld [vmem:[%s2536_s18 + $0x158] sm:$0xff]  ;;  %v417_v19 = vld [vmem:[%s2536_s18 + $0x1e0] sm:$0xff]  ;;  %v490_v21 = vpack.c.bf16 %v368_v13, %v367_v12  ;;  %v499_v23 = vpack.c.bf16 %v386_v18, %v385_v17 }
  0x21   : > { %2061 = vmatpush3.bf16.msra.mxu0 %v488_v57  ;;  %v418_v20 = vld [vmem:[%s2536_s18 + $0x1e8] sm:$0xff]  ;;  %v506_v22 = vpack.c.bf16 %v400_v16, %v399_v14  ;;  %v369_v24 = vld [vmem:[%s2536_s18 + $0x60] sm:$0xff]  ;;  %v387_v29 = vld [vmem:[%s2536_s18 + $0xf0] sm:$0xff] }
  0x22   : > { %2125 = vmatpush3.bf16.msra.mxu1 %v504_v58  ;;  %2062 = vmatprep.subr.bf16.mxu0 %v497_v59  ;;  %v370_v25 = vld [vmem:[%s2536_s18 + $0x68] sm:$0xff]  ;;  %v401_v26 = vld [vmem:[%s2536_s18 + $0x160] sm:$0xff]  ;;  %v515_v27 = vpack.c.bf16 %v418_v20, %v417_v19  ;;  %v388_v30 = vld [vmem:[%s2536_s18 + $0xf8] sm:$0xff] }
  0x23   : > { %2126 = vmatprep.subr.bf16.mxu1 %v513_v63  ;;  %v402_v28 = vld [vmem:[%s2536_s18 + $0x168] sm:$0xff]  ;;  %v419_v31 = vld [vmem:[%s2536_s18 + $0x1f0] sm:$0xff]  ;;  %v420_v32 = vld [vmem:[%s2536_s18 + $0x1f8] sm:$0xff]  ;;  %v491_v33 = vpack.c.bf16 %v370_v25, %v369_v24  ;;  %v500_v35 = vpack.c.bf16 %v388_v30, %v387_v29 }
  0x24   : > { %v507_v34 = vpack.c.bf16 %v402_v28, %v401_v26  ;;  %v371_v36 = vld [vmem:[%s2536_s18 + $0x70] sm:$0xff]  ;;  %v372_v37 = vld [vmem:[%s2536_s18 + $0x78] sm:$0xff]  ;;  %v516_v39 = vpack.c.bf16 %v420_v32, %v419_v31  ;;  %v437_v41 = vld [vmem:[%s2536_s18 + $0x280] sm:$0xff] }
  0x25   : > { %2063 = vmatpush3.bf16.msra.mxu0 %v489_v9  ;;  %v403_v38 = vld [vmem:[%s2536_s18 + $0x170] sm:$0xff]  ;;  %v404_v40 = vld [vmem:[%s2536_s18 + $0x178] sm:$0xff]  ;;  %v438_v42 = vld [vmem:[%s2536_s18 + $0x288] sm:$0xff]  ;;  %v492_v45 = vpack.c.bf16 %v372_v37, %v371_v36 }
  0x26   : > { %2127 = vmatpush3.bf16.msra.mxu1 %v505_v10  ;;  %2064 = vmatprep.subr.bf16.mxu0 %v498_v11  ;;  %v469_v43 = vld [vmem:[%s2536_s18 + $0x380] sm:$0xff]  ;;  %v470_v44 = vld [vmem:[%s2536_s18 + $0x388] sm:$0xff]  ;;  %v508_v47 = vpack.c.bf16 %v404_v40, %v403_v38  ;;  %v525_v48 = vpack.c.bf16 %v438_v42, %v437_v41  ;;  %v439_v58 = vld [vmem:[%s2536_s18 + $0x290] sm:$0xff] }
  0x27   : > { %2128 = vmatprep.subr.bf16.mxu1 %v514_v15  ;;  %v2609_v46 = vld [vmem:[%s3165_s2 + $0x40] sm:$0xff]  ;;  %v422_v50 = vld [vmem:[%s2536_s18 + $0x208] sm:$0xff]  ;;  %v541_v52 = vpack.c.bf16 %v470_v44, %v469_v43  ;;  %v440_v59 = vld [vmem:[%s2536_s18 + $0x298] sm:$0xff] }
  0x28   : > { %v421_v49 = vld [vmem:[%s2536_s18 + $0x200] sm:$0xff]  ;;  %v2621_v53 = vld [vmem:[%s3165_s2 + $0x48] sm:$0xff]  ;;  %v471_v62 = vld [vmem:[%s2536_s18 + $0x390] sm:$0xff]  ;;  %v526_v2 = vpack.c.bf16 %v440_v59, %v439_v58 }
  0x29   : > { %2065 = vmatpush3.bf16.msra.mxu0 %v490_v21  ;;  %v2616_v51 = vld [vmem:[%s3165_s2 + $0x60] sm:$0xff]  ;;  %v2626_v54 = vld [vmem:[%s3165_s2 + $0x68] sm:$0xff]  ;;  %v517_v61 = vpack.c.bf16 %v422_v50, %v421_v49  ;;  %v472_v63 = vld [vmem:[%s2536_s18 + $0x398] sm:$0xff] }
  0x2a   : > { %2129 = vmatpush3.bf16.msra.mxu1 %v506_v22  ;;  %2066 = vmatprep.subr.bf16.mxu0 %v499_v23  ;;  %v453_v55 = vld [vmem:[%s2536_s18 + $0x300] sm:$0xff]  ;;  %v454_v57 = vld [vmem:[%s2536_s18 + $0x308] sm:$0xff]  ;;  %v1975_v3 = vcombine.high %v2609_v46, %v2616_v51  ;;  %v1977_v0 = vcombine.high %v2621_v53, %v2626_v54  ;;  %v423_v1 = vld [vmem:[%s2536_s18 + $0x210] sm:$0xff]  ;;  %v542_v8 = vpack.c.bf16 %v472_v63, %v471_v62 }
  0x2b   : > { %2130 = vmatprep.subr.bf16.mxu1 %v515_v27  ;;  %v424_v5 = vld [vmem:[%s2536_s18 + $0x218] sm:$0xff]  ;;  %v533_v6 = vpack.c.bf16 %v454_v57, %v453_v55  ;;  %v441_v4 = vld [vmem:[%s2536_s18 + $0x2a0] sm:$0xff]  ;;  %v442_v7 = vld [vmem:[%s2536_s18 + $0x2a8] sm:$0xff]  ;;  %v1974_v23 = vcombine.low %v2609_v46, %v2616_v51  ;;  %v1976_v28 = vcombine.low %v2621_v53, %v2626_v54 }
  0x2c   : > { %v455_v9 = vld [vmem:[%s2536_s18 + $0x310] sm:$0xff]  ;;  %v456_v10 = vld [vmem:[%s2536_s18 + $0x318] sm:$0xff]  ;;  %v518_v11 = vpack.c.bf16 %v424_v5, %v423_v1  ;;  %v2651_v12 = vld [vmem:[%s3165_s2 + $0x80] sm:$0xff]  ;;  %v527_v18 = vpack.c.bf16 %v442_v7, %v441_v4 }
  0x2d   : > { %2067 = vmatpush3.bf16.msra.mxu0 %v491_v33  ;;  %v473_v13 = vld [vmem:[%s2536_s18 + $0x3a0] sm:$0xff]  ;;  %v474_v14 = vld [vmem:[%s2536_s18 + $0x3a8] sm:$0xff]  ;;  %v534_v19 = vpack.c.bf16 %v456_v10, %v455_v9  ;;  %v443_v26 = vld [vmem:[%s2536_s18 + $0x2b0] sm:$0xff] }
  0x2e   : > { %2131 = vmatpush3.bf16.msra.mxu1 %v507_v34  ;;  %2068 = vmatprep.subr.bf16.mxu0 %v500_v35  ;;  %v2658_v15 = vld [vmem:[%s3165_s2 + $0xa0] sm:$0xff]  ;;  %v2663_v16 = vld [vmem:[%s3165_s2 + $0x88] sm:$0xff]  ;;  %v543_v24 = vpack.c.bf16 %v474_v14, %v473_v13  ;;  %v444_v27 = vld [vmem:[%s2536_s18 + $0x2b8] sm:$0xff] }
  0x2f   : > { %2132 = vmatprep.subr.bf16.mxu1 %v516_v39  ;;  %v2668_v17 = vld [vmem:[%s3165_s2 + $0xa8] sm:$0xff]  ;;  %v425_v20 = vld [vmem:[%s2536_s18 + $0x220] sm:$0xff]  ;;  %v1983_v29 = vcombine.high %v2651_v12, %v2658_v15  ;;  %v475_v30 = vld [vmem:[%s2536_s18 + $0x3b0] sm:$0xff]  ;;  %v528_v35 = vpack.c.bf16 %v444_v27, %v443_v26  ;;  %v1982_v55 = vcombine.low %v2651_v12, %v2658_v15 }
  0x30   : > { %v426_v21 = vld [vmem:[%s2536_s18 + $0x228] sm:$0xff]  ;;  %v457_v22 = vld [vmem:[%s2536_s18 + $0x320] sm:$0xff]  ;;  %v476_v31 = vld [vmem:[%s2536_s18 + $0x3b8] sm:$0xff]  ;;  %v1985_v32 = vcombine.high %v2663_v16, %v2668_v17 }
  0x31   : > { %2069 = vmatpush3.bf16.msra.mxu0 %v492_v45  ;;  %v458_v25 = vld [vmem:[%s2536_s18 + $0x328] sm:$0xff]  ;;  %v519_v33 = vpack.c.bf16 %v426_v21, %v425_v20  ;;  %v427_v36 = vld [vmem:[%s2536_s18 + $0x230] sm:$0xff]  ;;  %v428_v37 = vld [vmem:[%s2536_s18 + $0x238] sm:$0xff]  ;;  %v544_v39 = vpack.c.bf16 %v476_v31, %v475_v30 }
  0x32   : > { %2133 = vmatpush3.bf16.msra.mxu1 %v508_v47  ;;  %2182 = vmatprep.subr.bf16.mxu0 %v525_v48  ;;  %v535_v34 = vpack.c.bf16 %v458_v25, %v457_v22  ;;  %v459_v38 = vld [vmem:[%s2536_s18 + $0x330] sm:$0xff]  ;;  %v460_v40 = vld [vmem:[%s2536_s18 + $0x338] sm:$0xff]  ;;  %v445_v41 = vld [vmem:[%s2536_s18 + $0x2c0] sm:$0xff]  ;;  %v520_v49 = vpack.c.bf16 %v428_v37, %v427_v36 }
  0x33   : > { %2246 = vmatprep.subr.bf16.mxu1 %v541_v52  ;;  %v446_v42 = vld [vmem:[%s2536_s18 + $0x2c8] sm:$0xff]  ;;  %v2695_v43 = vld [vmem:[%s3165_s2 + $0xc0] sm:$0xff]  ;;  %v536_v50 = vpack.c.bf16 %v460_v40, %v459_v38  ;;  %v447_v58 = vld [vmem:[%s2536_s18 + $0x2d0] sm:$0xff] }
  0x34   : > { %1062 = vmatmul.mubr.bf16.vlgmr.msra.gmra.mrb[0].mxu0 %v1966_v56  ;;  %v477_v44 = vld [vmem:[%s2536_s18 + $0x3c0] sm:$0xff]  ;;  %v478_v45 = vld [vmem:[%s2536_s18 + $0x3c8] sm:$0xff]  ;;  %v529_v51 = vpack.c.bf16 %v446_v42, %v445_v41  ;;  %v448_v59 = vld [vmem:[%s2536_s18 + $0x2d8] sm:$0xff] }
  0x35   : > { %1159 = vmatmul.mubr.bf16.vlgmr.msra.gmra.mrb[0].mxu1 %v1968_v60  ;;  %2183 = vmatpush3.bf16.msra.mxu0 %v517_v61  ;;  %v2702_v46 = vld [vmem:[%s3165_s2 + $0xe0] sm:$0xff]  ;;  %v2707_v47 = vld [vmem:[%s3165_s2 + $0xc8] sm:$0xff]  ;;  %v545_v56 = vpack.c.bf16 %v478_v45, %v477_v44  ;;  %v1984_v60 = vcombine.low %v2663_v16, %v2668_v17  ;;  %v479_v62 = vld [vmem:[%s2536_s18 + $0x3d0] sm:$0xff]  ;;  %v530_v4 = vpack.c.bf16 %v448_v59, %v447_v58 }
  0x36   : > { %1069 = vmatprep.mubr.bf16.mxu0 %v1975_v3  ;;  %1166 = vmatprep.mubr.bf16.mxu1 %v1977_v0  ;;  %v2712_v48 = vld [vmem:[%s3165_s2 + $0xe8] sm:$0xff]  ;;  %v429_v52 = vld [vmem:[%s2536_s18 + $0x240] sm:$0xff]  ;;  %v1991_v61 = vcombine.high %v2695_v43, %v2702_v46  ;;  %v480_v63 = vld [vmem:[%s2536_s18 + $0x3d8] sm:$0xff]  ;;  %v1990_v26 = vcombine.low %v2695_v43, %v2702_v46 }
  0x37   : > { %2247 = vmatpush3.bf16.msra.mxu1 %v533_v6  ;;  %2184 = vmatprep.subr.bf16.mxu0 %v526_v2  ;;  %v430_v53 = vld [vmem:[%s2536_s18 + $0x248] sm:$0xff]  ;;  %v461_v54 = vld [vmem:[%s2536_s18 + $0x340] sm:$0xff]  ;;  %v1993_v3 = vcombine.high %v2707_v47, %v2712_v48  ;;  %v431_v1 = vld [vmem:[%s2536_s18 + $0x250] sm:$0xff]  ;;  %v546_v10 = vpack.c.bf16 %v480_v63, %v479_v62 }
  0x38   : > { %2248 = vmatprep.subr.bf16.mxu1 %v542_v8  ;;  %v462_v57 = vld [vmem:[%s2536_s18 + $0x348] sm:$0xff]  ;;  %v521_v0 = vpack.c.bf16 %v430_v53, %v429_v52  ;;  %v432_v5 = vld [vmem:[%s2536_s18 + $0x258] sm:$0xff]  ;;  %v463_v6 = vld [vmem:[%s2536_s18 + $0x350] sm:$0xff] }
  0x39   : > { %2185 = vmatpush3.bf16.msra.mxu0 %v518_v11  ;;  %v537_v2 = vpack.c.bf16 %v462_v57, %v461_v54  ;;  %v464_v7 = vld [vmem:[%s2536_s18 + $0x358] sm:$0xff]  ;;  %v2737_v8 = vld [vmem:[%s3165_s2 + $0x100] sm:$0xff]  ;;  %v450_v12 = vld [vmem:[%s2536_s18 + $0x2e8] sm:$0xff]  ;;  %v522_v17 = vpack.c.bf16 %v432_v5, %v431_v1 }
  0x3a   : > { %2186 = vmatprep.subr.bf16.mxu0 %v527_v18  ;;  %v2742_v9 = vld [vmem:[%s3165_s2 + $0x120] sm:$0xff]  ;;  %v2750_v14 = vld [vmem:[%s3165_s2 + $0x108] sm:$0xff]  ;;  %v538_v21 = vpack.c.bf16 %v464_v7, %v463_v6  ;;  %v451_v25 = vld [vmem:[%s2536_s18 + $0x2f0] sm:$0xff] }
  0x3b   : > { %2249 = vmatpush3.bf16.msra.mxu1 %v534_v19  ;;  %v449_v11 = vld [vmem:[%s2536_s18 + $0x2e0] sm:$0xff]  ;;  %v2755_v15 = vld [vmem:[%s3165_s2 + $0x128] sm:$0xff]  ;;  %v1999_v30 = vcombine.high %v2737_v8, %v2742_v9  ;;  %v483_v31 = vld [vmem:[%s2536_s18 + $0x3f0] sm:$0xff] }
  0x3c   : > { %1070 = vmatmul.mubr.bf16.gmra.mrb[4].mxu0 %v1974_v23  ;;  %2250 = vmatprep.subr.bf16.mxu1 %v543_v24  ;;  %v481_v13 = vld [vmem:[%s2536_s18 + $0x3e0] sm:$0xff]  ;;  %v482_v16 = vld [vmem:[%s2536_s18 + $0x3e8] sm:$0xff]  ;;  %v531_v22 = vpack.c.bf16 %v450_v12, %v449_v11  ;;  %v435_v36 = vld [vmem:[%s2536_s18 + $0x270] sm:$0xff]  ;;  %v2000_v52 = vcombine.low %v2750_v14, %v2755_v15 }
  0x3d   : > { %1167 = vmatmul.mubr.bf16.gmra.mrb[4].mxu1 %v1976_v28  ;;  %1077 = vmatprep.mubr.bf16.mxu0 %v1983_v29  ;;  %v433_v18 = vld [vmem:[%s2536_s18 + $0x260] sm:$0xff]  ;;  %v434_v19 = vld [vmem:[%s2536_s18 + $0x268] sm:$0xff]  ;;  %v547_v27 = vpack.c.bf16 %v482_v16, %v481_v13  ;;  %v452_v28 = vld [vmem:[%s2536_s18 + $0x2f8] sm:$0xff]  ;;  %v1992_v29 = vcombine.low %v2707_v47, %v2712_v48 }
  0x3e   : > { %1174 = vmatprep.mubr.bf16.mxu1 %v1985_v32  ;;  %2187 = vmatpush3.bf16.msra.mxu0 %v519_v33  ;;  %v613_v20 = vld [vmem:[%s3166_s3] sm:$0xff]  ;;  %v466_v24 = vld [vmem:[%s2536_s18 + $0x368] sm:$0xff]  ;;  %v484_v32 = vld [vmem:[%s2536_s18 + $0x3f8] sm:$0xff]  ;;  %v532_v38 = vpack.c.bf16 %v452_v28, %v451_v25 }
  0x3f   : > { %2251 = vmatpush3.bf16.msra.mxu1 %v535_v34  ;;  %2188 = vmatprep.subr.bf16.mxu0 %v528_v35  ;;  %v465_v23 = vld [vmem:[%s2536_s18 + $0x360] sm:$0xff]  ;;  %v615_v33 = vld [vmem:[%s3166_s3 + $0x10] sm:$0xff]  ;;  %v2001_v34 = vcombine.high %v2750_v14, %v2755_v15  ;;  %v523_v35 = vpack.c.bf16 %v434_v19, %v433_v18  ;;  %v548_v40 = vpack.c.bf16 %v484_v32, %v483_v31  ;;  %v468_v42 = vld [vmem:[%s2536_s18 + $0x378] sm:$0xff] }
  0x40   : > { %2252 = vmatprep.subr.bf16.mxu1 %v544_v39  ;;  %631 = vperm.xlu0 %2427, %v613_v20   ;;  %v539_v37 = vpack.c.bf16 %v466_v24, %v465_v23  ;;  %v436_v39 = vld [vmem:[%s2536_s18 + $0x278] sm:$0xff]  ;;  %v467_v41 = vld [vmem:[%s2536_s18 + $0x370] sm:$0xff]  ;;  %v589_v43 = vld [vmem:[%s3165_s2 + $0x140] sm:$0xff] }
  0x41   : > { %641 = vperm.xlu1 %2428, %v615_v33   ;;  %v593_v44 = vld [vmem:[%s3165_s2 + $0x160] sm:$0xff]  ;;  %v614_v45 = vld [vmem:[%s3166_s3 + $0x8] sm:$0xff]  ;;  %v524_v46 = vpack.c.bf16 %v436_v39, %v435_v36  ;;  %v616_v47 = vld [vmem:[%s3166_s3 + $0x18] sm:$0xff] }
  0x42   : > { %2189 = vmatpush3.bf16.msra.mxu0 %v520_v49  ;;  %v590_v48 = vld [vmem:[%s3165_s2 + $0x148] sm:$0xff]  ;;  %v2007_v53 = vcombine.high %v589_v43, %v593_v44  ;;  %v617_v54 = vld [vmem:[%s3166_s3 + $0x20] sm:$0xff]  ;;  %v619_v59 = vld [vmem:[%s3166_s3 + $0x30] sm:$0xff] }
  0x43   : > { %2253 = vmatpush3.bf16.msra.mxu1 %v536_v50  ;;  %2190 = vmatprep.subr.bf16.mxu0 %v529_v51  ;;  %v594_v49 = vld [vmem:[%s3165_s2 + $0x168] sm:$0xff]  ;;  %v540_v50 = vpack.c.bf16 %v468_v42, %v467_v41  ;;  %v1998_v51 = vcombine.low %v2737_v8, %v2742_v9  ;;  %v597_v58 = vld [vmem:[%s3165_s2 + $0x180] sm:$0xff]  ;;  %v620_v63 = vld [vmem:[%s3166_s3 + $0x38] sm:$0xff] }
  0x44   : > { %1078 = vmatmul.mubr.bf16.gmra.mrb[8].mxu0 %v1982_v55  ;;  %2254 = vmatprep.subr.bf16.mxu1 %v545_v56  ;;  %v2009_v55 = vcombine.high %v590_v48, %v594_v49  ;;  %v2450_v56 = vmov 0.0   ;;  %v618_v57 = vld [vmem:[%s3166_s3 + $0x28] sm:$0xff]  ;;  %v621_v5 = vld [vmem:[%s3166_s3 + $0x40] sm:$0xff]  ;;  %v624_v11 = vld [vmem:[%s3166_s3 + $0x58] sm:$0xff] }
  0x45   : > { %1175 = vmatmul.mubr.bf16.gmra.mrb[8].mxu1 %v1984_v60  ;;  %1085 = vmatprep.mubr.bf16.mxu0 %v1991_v61  ;;  %v601_v60 = vld [vmem:[%s3165_s2 + $0x1a0] sm:$0xff]  ;;  %v598_v61 = vld [vmem:[%s3165_s2 + $0x188] sm:$0xff]  ;;  %v627_v18 = vld [vmem:[%s3166_s3 + $0x70] sm:$0xff] }
  0x46   : > { %1182 = vmatprep.mubr.bf16.mxu1 %v1993_v3  ;;  %2191 = vmatpush3.bf16.msra.mxu0 %v521_v0  ;;  %v602_v62 = vld [vmem:[%s3165_s2 + $0x1a8] sm:$0xff]  ;;  %v2006_v3 = vcombine.low %v589_v43, %v593_v44  ;;  %v2008_v0 = vcombine.low %v590_v48, %v594_v49  ;;  %v2015_v1 = vcombine.high %v597_v58, %v601_v60  ;;  %v605_v7 = vld [vmem:[%s3165_s2 + $0x1c0] sm:$0xff]  ;;  %v551_v19 = vld [vmem:[%s3165_s2 + $0x10] sm:$0xff] }
  0x47   : > { %2255 = vmatpush3.bf16.msra.mxu1 %v537_v2  ;;  %2192 = vmatprep.subr.bf16.mxu0 %v530_v4  ;;  %v2017_v6 = vcombine.high %v598_v61, %v602_v62  ;;  %v622_v2 = vld [vmem:[%s3166_s3 + $0x48] sm:$0xff]  ;;  %v623_v4 = vld [vmem:[%s3166_s3 + $0x50] sm:$0xff]  ;;  %v609_v8 = vld [vmem:[%s3165_s2 + $0x1e0] sm:$0xff]  ;;  %v2014_v12 = vcombine.low %v597_v58, %v601_v60  ;;  %v2016_v13 = vcombine.low %v598_v61, %v602_v62 }
  0x48   : > { %2256 = vmatprep.subr.bf16.mxu1 %v546_v10  ;;  %636 = vperm.xlu0 %2427, %v614_v45   ;;  %v606_v9 = vld [vmem:[%s3165_s2 + $0x1c8] sm:$0xff]  ;;  %v2023_v14 = vcombine.high %v605_v7, %v609_v8  ;;  %v625_v15 = vld [vmem:[%s3166_s3 + $0x60] sm:$0xff]  ;;  %v555_v20 = vld [vmem:[%s3165_s2 + $0x30] sm:$0xff]  ;;  %v2022_v24 = vcombine.low %v605_v7, %v609_v8 }
  0x49   : > { %646 = vperm.xlu1 %2428, %v616_v47   ;;  %v610_v10 = vld [vmem:[%s3165_s2 + $0x1e8] sm:$0xff]  ;;  %v628_v23 = vld [vmem:[%s3166_s3 + $0x78] sm:$0xff]  ;;  %v1659_v28 = vld [vmem:[%s339_s20] sm:$0xff] }
  0x4a   : > { %2193 = vmatpush3.bf16.msra.mxu0 %v522_v17  ;;  %v2025_v16 = vcombine.high %v606_v9, %v610_v10  ;;  %v626_v17 = vld [vmem:[%s3166_s3 + $0x68] sm:$0xff]  ;;  %v2024_v25 = vcombine.low %v606_v9, %v610_v10  ;;  %v560_v31 = vld [vmem:[%s3165_s2 + $0x58] sm:$0xff]  ;;  %v567_v39 = vld [vmem:[%s3165_s2 + $0x90] sm:$0xff] }
  0x4b   : > { %2257 = vmatpush3.bf16.msra.mxu1 %v538_v21  ;;  %2194 = vmatprep.subr.bf16.mxu0 %v531_v22  ;;  %v552_v21 = vld [vmem:[%s3165_s2 + $0x18] sm:$0xff]  ;;  %v1660_v33 = vld [vmem:[%s339_s20 + $0x8] sm:$0xff]  ;;  %v2431_v48 = vld [vmem:[%s3168_s5 + $0x10] sm:$0xff]  }
  0x4c   : > { %1086 = vmatmul.mubr.bf16.gmra.mrb[12].mxu0 %v1990_v26  ;;  %2258 = vmatprep.subr.bf16.mxu1 %v547_v27  ;;  %v556_v22 = vld [vmem:[%s3165_s2 + $0x38] sm:$0xff]  ;;  %v1971_v26 = vcombine.high %v551_v19, %v555_v20  ;;  %v2430_v41 = vld [vmem:[%s3168_s5 + $0x8] sm:$0xff]   ;;  %v575_v49 = vld [vmem:[%s3165_s2 + $0xd0] sm:$0xff] }
  0x4d   : > { %1183 = vmatmul.mubr.bf16.gmra.mrb[12].mxu1 %v1992_v29  ;;  %1093 = vmatprep.mubr.bf16.mxu0 %v1999_v30  ;;  %v1973_v27 = vcombine.high %v552_v21, %v556_v22  ;;  %v559_v29 = vld [vmem:[%s3165_s2 + $0x50] sm:$0xff]  ;;  %v564_v32 = vld [vmem:[%s3165_s2 + $0x78] sm:$0xff]  ;;  %v2434_v62 = vld [vmem:[%s3168_s5 + $0x28] sm:$0xff]  }
  0x4e   : > { %1190 = vmatprep.mubr.bf16.mxu1 %v2001_v34  ;;  %2195 = vmatpush3.bf16.msra.mxu0 %v523_v35  ;;  %v563_v30 = vld [vmem:[%s3165_s2 + $0x70] sm:$0xff]  ;;  %v1970_v34 = vcombine.low %v551_v19, %v555_v20  ;;  %v1972_v35 = vcombine.low %v552_v21, %v556_v22  ;;  %v568_v42 = vld [vmem:[%s3165_s2 + $0x98] sm:$0xff]  ;;  %v1980_v45 = vcombine.low %v560_v31, %v564_v32 }
  0x4f   : > { %2259 = vmatpush3.bf16.msra.mxu1 %v539_v37  ;;  %2196 = vmatprep.subr.bf16.mxu0 %v532_v38  ;;  %v1979_v36 = vcombine.high %v559_v29, %v563_v30  ;;  %v1981_v37 = vcombine.high %v560_v31, %v564_v32  ;;  %v2429_v38 = vld [vmem:[%s3168_s5] sm:$0xff]   ;;  %v572_v43 = vld [vmem:[%s3165_s2 + $0xb8] sm:$0xff]  ;;  %v1978_v44 = vcombine.low %v559_v29, %v563_v30  ;;  %v583_v60 = vld [vmem:[%s3165_s2 + $0x110] sm:$0xff] }
  0x50   : > { %2260 = vmatprep.subr.bf16.mxu1 %v548_v40  ;;  %651 = vperm.xlu0 %2427, %v617_v54   ;;  %v571_v40 = vld [vmem:[%s3165_s2 + $0xb0] sm:$0xff]  ;;  %v1989_v47 = vcombine.high %v568_v42, %v572_v43  ;;  %v2436_v8 = vld [vmem:[%s3168_s5 + $0x38] sm:$0xff]  }
  0x51   : > { %656 = vperm.xlu1 %2428, %v618_v57   ;;  %v1986_v54 = vcombine.low %v567_v39, %v571_v40  ;;  %v587_v61 = vld [vmem:[%s3165_s2 + $0x130] sm:$0xff]  ;;  %v592_v9 = vld [vmem:[%s3165_s2 + $0x158] sm:$0xff] }
  0x52   : > { %2197 = vmatpush3.bf16.msra.mxu0 %v524_v46  ;;  %v1987_v46 = vcombine.high %v567_v39, %v571_v40  ;;  %v595_v7 = vld [vmem:[%s3165_s2 + $0x170] sm:$0xff]  ;;  %v596_v10 = vld [vmem:[%s3165_s2 + $0x178] sm:$0xff] }
  0x53   : > { %2261 = vmatpush3.bf16.msra.mxu1 %v540_v50  ;;  %2336 = vmatprep.subr.bf16.mxu0 %v2450_v56  ;;  %v579_v50 = vld [vmem:[%s3165_s2 + $0xf0] sm:$0xff]  ;;  %v2012_v20 = vcombine.low %v592_v9, %v596_v10 }
  0x54   : > { %1094 = vmatmul.mubr.bf16.gmra.mrb[16].mxu0 %v1998_v51  ;;  %661 = vperm.xlu0 %2427, %v619_v59   ;;  %v2432_v51 = vld [vmem:[%s3168_s5 + $0x18] sm:$0xff]   ;;  %v1995_v57 = vcombine.high %v575_v49, %v579_v50  ;;  %v2433_v59 = vld [vmem:[%s3168_s5 + $0x20] sm:$0xff]  }
  0x55   : > { %1191 = vmatmul.mubr.bf16.gmra.mrb[16].mxu1 %v2000_v52  ;;  %1101 = vmatprep.mubr.bf16.mxu0 %v2007_v53  ;;  %v576_v52 = vld [vmem:[%s3165_s2 + $0xd8] sm:$0xff] }
  0x56   : > { %1198 = vmatprep.mubr.bf16.mxu1 %v2009_v55  ;;  %666 = vperm.xlu1 %2428, %v620_v63   ;;  %v580_v53 = vld [vmem:[%s3165_s2 + $0xf8] sm:$0xff]  ;;  %v1988_v55 = vcombine.low %v568_v42, %v572_v43 }
  0x57   : > { %v1997_v58 = vcombine.high %v576_v52, %v580_v53  ;;  %v584_v63 = vld [vmem:[%s3165_s2 + $0x118] sm:$0xff] }
  0x58   : > { %671 = vperm.xlu0 %2427, %v621_v5   ;;  %v2003_v5 = vcombine.high %v583_v60, %v587_v61 }
  0x5a   : > { %676 = vperm.xlu1 %2428, %v622_v2   ;;  %v2435_v2 = vld [vmem:[%s3168_s5 + $0x30] sm:$0xff]  }
  0x5c   : > { %1102 = vmatmul.mubr.bf16.gmra.mrb[20].mxu0 %v2006_v3  ;;  %681 = vperm.xlu0 %2427, %v623_v4   ;;  %v588_v3 = vld [vmem:[%s3165_s2 + $0x138] sm:$0xff]  ;;  %v591_v4 = vld [vmem:[%s3165_s2 + $0x150] sm:$0xff] }
  0x5d   : > { %1199 = vmatmul.mubr.bf16.gmra.mrb[20].mxu1 %v2008_v0  ;;  %1109 = vmatprep.mubr.bf16.mxu0 %v2015_v1  ;;  %v1994_v0 = vcombine.low %v575_v49, %v579_v50  ;;  %v1996_v1 = vcombine.low %v576_v52, %v580_v53  ;;  %v2010_v19 = vcombine.low %v591_v4, %v595_v7 }
  0x5e   : > { %1206 = vmatprep.mubr.bf16.mxu1 %v2017_v6  ;;  %686 = vperm.xlu1 %2428, %v624_v11   ;;  %v2005_v6 = vcombine.high %v584_v63, %v588_v3  ;;  %v2002_v11 = vcombine.low %v583_v60, %v587_v61 }
  0x60   : > { %691 = vperm.xlu0 %2427, %v625_v15   ;;  %v599_v15 = vld [vmem:[%s3165_s2 + $0x190] sm:$0xff] }
  0x62   : > { %696 = vperm.xlu1 %2428, %v626_v17   ;;  %v600_v17 = vld [vmem:[%s3165_s2 + $0x198] sm:$0xff] }
  0x64   : > { %1110 = vmatmul.mubr.bf16.gmra.mrb[24].mxu0 %v2014_v12  ;;  %701 = vperm.xlu0 %2427, %v627_v18   ;;  %v2004_v12 = vcombine.low %v584_v63, %v588_v3  ;;  %v604_v18 = vld [vmem:[%s3165_s2 + $0x1b8] sm:$0xff] }
  0x65   : > { %1207 = vmatmul.mubr.bf16.gmra.mrb[24].mxu1 %v2016_v13  ;;  %1117 = vmatprep.mubr.bf16.mxu0 %v2023_v14  ;;  %v2011_v13 = vcombine.high %v591_v4, %v595_v7  ;;  %v2013_v14 = vcombine.high %v592_v9, %v596_v10  ;;  %v2021_v22 = vcombine.high %v600_v17, %v604_v18 }
  0x66   : > { %1214 = vmatprep.mubr.bf16.mxu1 %v2025_v16  ;;  %706 = vperm.xlu1 %2428, %v628_v23   ;;  %v603_v16 = vld [vmem:[%s3165_s2 + $0x1b0] sm:$0xff] }
  0x67   : > { %v2019_v21 = vcombine.high %v599_v15, %v603_v16  ;;  %v607_v23 = vld [vmem:[%s3165_s2 + $0x1d0] sm:$0xff] }
  0x6a   : > { %1664 = vperm.xlu1 %2428, %v1659_v28   ;;  %v2020_v28 = vcombine.low %v600_v17, %v604_v18 }
  0x6c   : > { %1118 = vmatmul.mubr.bf16.gmra.mrb[28].mxu0 %v2022_v24  ;;  %v611_v24 = vld [vmem:[%s3165_s2 + $0x1f0] sm:$0xff] }
  0x6d   : > { %1215 = vmatmul.mubr.bf16.gmra.mrb[28].mxu1 %v2024_v25  ;;  %1255 = vmatprep.mubr.bf16.mxu0 %v1971_v26  ;;  %v608_v25 = vld [vmem:[%s3165_s2 + $0x1d8] sm:$0xff]  ;;  %v2027_v29 = vcombine.high %v607_v23, %v611_v24  ;;  %v2026_v31 = vcombine.low %v607_v23, %v611_v24 }
  0x6e   : > { %1352 = vmatprep.mubr.bf16.mxu1 %v1973_v27  ;;  %1667 = vperm.xlu1 %2428, %v1660_v33   ;;  %v612_v26 = vld [vmem:[%s3165_s2 + $0x1f8] sm:$0xff]  ;;  %v2018_v27 = vcombine.low %v599_v15, %v603_v16  ;;  %v1417_v33 = vld [vmem:[%s347_s14] sm:$0x1] }
  0x6f   : > { %v2029_v30 = vcombine.high %v608_v25, %v612_v26  ;;  %v2028_v32 = vcombine.low %v608_v25, %v612_v26 }
  0x74   : > { %1256 = vmatmul.mubr.bf16.vlgmr.msra.gmra.mrb[32].mxu0 %v1970_v34  ;;  %v1418_v34 = vpack.c.bf16 %v1417_v33, %v1417_v33 }
  0x75   : > { %1353 = vmatmul.mubr.bf16.vlgmr.msra.gmra.mrb[32].mxu1 %v1972_v35  ;;  %1263 = vmatprep.mubr.bf16.mxu0 %v1979_v36  ;;  %v2452_v35 = vmov 0.0|0.0  }
  0x76   : > { %1360 = vmatprep.mubr.bf16.mxu1 %v1981_v37  ;;  %2337 = vmatpush3.bf16.msra.mxu0 %v2429_v38 }
  0x77   : > { %2338 = vmatprep.subr.bf16.mxu0 %v2450_v56  ;;  %2391 = vmatprep.subr.bf16.mxu1 %v2452_v35 }
  0x7a   : > { %2339 = vmatpush3.bf16.msra.mxu0 %v2430_v41 }
  0x7b   : > { %2340 = vmatprep.subr.bf16.mxu0 %v2450_v56 }
  0x7c   : > { %1264 = vmatmul.mubr.bf16.gmra.mrb[36].mxu0 %v1978_v44 }
  0x7d   : > { %1361 = vmatmul.mubr.bf16.gmra.mrb[36].mxu1 %v1980_v45  ;;  %1271 = vmatprep.mubr.bf16.mxu0 %v1987_v46 }
  0x7e   : > { %1368 = vmatprep.mubr.bf16.mxu1 %v1989_v47  ;;  %2341 = vmatpush3.bf16.msra.mxu0 %v2431_v48 }
  0x7f   : > { %2342 = vmatprep.subr.bf16.mxu0 %v2450_v56 }
  0x82   : > { %2343 = vmatpush3.bf16.msra.mxu0 %v2432_v51 }
  0x83   : > { %2344 = vmatprep.subr.bf16.mxu0 %v2450_v56 }
  0x84   : > { %1272 = vmatmul.mubr.bf16.gmra.mrb[40].mxu0 %v1986_v54 }
  0x85   : > { %1369 = vmatmul.mubr.bf16.gmra.mrb[40].mxu1 %v1988_v55  ;;  %1279 = vmatprep.mubr.bf16.mxu0 %v1995_v57 }
  0x86   : > { %1376 = vmatprep.mubr.bf16.mxu1 %v1997_v58  ;;  %2345 = vmatpush3.bf16.msra.mxu0 %v2433_v59 }
  0x87   : > { %2346 = vmatprep.subr.bf16.mxu0 %v2450_v56 }
  0x8a   : > { %2347 = vmatpush3.bf16.msra.mxu0 %v2434_v62 }
  0x8b   : > { %2348 = vmatprep.subr.bf16.mxu0 %v2450_v56 }
  0x8c   : > { %1280 = vmatmul.mubr.bf16.gmra.mrb[44].mxu0 %v1994_v0 }
  0x8d   : > { %1377 = vmatmul.mubr.bf16.gmra.mrb[44].mxu1 %v1996_v1  ;;  %1287 = vmatprep.mubr.bf16.mxu0 %v2003_v5 }
  0x8e   : > { %1384 = vmatprep.mubr.bf16.mxu1 %v2005_v6  ;;  %2349 = vmatpush3.bf16.msra.mxu0 %v2435_v2 }
  0x8f   : > { %2350 = vmatprep.subr.bf16.mxu0 %v2450_v56 }
  0x92   : > { %2351 = vmatpush3.bf16.msra.mxu0 %v2436_v8 }
  0x94   : > { %1288 = vmatmul.mubr.bf16.gmra.mrb[48].mxu0 %v2002_v11 }
  0x95   : > { %1385 = vmatmul.mubr.bf16.gmra.mrb[48].mxu1 %v2004_v12  ;;  %1295 = vmatprep.mubr.bf16.mxu0 %v2011_v13 }
  0x96   : > { %1392 = vmatprep.mubr.bf16.mxu1 %v2013_v14 }
  0x9c   : > { %1296 = vmatmul.mubr.bf16.gmra.mrb[52].mxu0 %v2010_v19 }
  0x9d   : > { %1393 = vmatmul.mubr.bf16.gmra.mrb[52].mxu1 %v2012_v20  ;;  %1303 = vmatprep.mubr.bf16.mxu0 %v2019_v21 }
  0x9e   : > { %1400 = vmatprep.mubr.bf16.mxu1 %v2021_v22 }
  0xa4   : > { %1304 = vmatmul.mubr.bf16.gmra.mrb[56].mxu0 %v2018_v27 }
  0xa5   : > { %1401 = vmatmul.mubr.bf16.gmra.mrb[56].mxu1 %v2020_v28  ;;  %1311 = vmatprep.mubr.bf16.mxu0 %v2027_v29 }
  0xa6   : > { %1408 = vmatprep.mubr.bf16.mxu1 %v2029_v30 }
  0xac   : > { %1312 = vmatmul.mubr.bf16.gmra.mrb[60].mxu0 %v2026_v31 }
  0xad   : > { %1409 = vmatmul.mubr.bf16.gmra.mrb[60].mxu1 %v2028_v32  ;;  %2352 = vmatprep.mubr.msk.bf16.mxu0 %vm2451_vm0, %v2450_v56 }
  0xae   : > { %2388 = vmatprep.mubr.msk.f32.mxu1 %vm2451_vm0, %v2450_v56 }
  0xb4   : > { %2353 = vmatmul.mubr.bf16.vlgmr.msra.gmra.mrb[64].mxu0 %v1418_v34 }
  0xbf   : > { %v632_v36 = vpop.permute.xlu0 %631 }
  0xc0   : > { %v642_v37 = vpop.permute.xlu1 %641 }
  0xc7   : > { %v637_v39 = vpop.permute.xlu0 %636 }
  0xc8   : > { %v647_v57 = vpop.permute.xlu1 %646 }
  0xcf   : > { %v652_v8 = vpop.permute.xlu0 %651 }
  0xd0   : > { %v657_v11 = vpop.permute.xlu1 %656 }
  0xd3   : > { %v662_v26 = vpop.permute.xlu0 %661 }
  0xd5   : > { %v667_v29 = vpop.permute.xlu1 %666 }
 0x107   : > { %v2070_v38 = vpop.f32.mrb[0].mxu0 }
 0x108   : > { %v2134_v40 = vpop.f32.mrb[0].mxu1  ;;  %v2071_v41 = vpop.f32.mrb[1].mxu0 }
 0x109   : > { %v2072_v42 = vadd.f32 %v2071_v41, %v2070_v38  ;;  %v2135_v43 = vpop.f32.mrb[1].mxu1  ;;  %v2073_v44 = vpop.f32.mrb[2].mxu0 }
 0x10a   : > { %v2136_v45 = vadd.f32 %v2135_v43, %v2134_v40  ;;  %v2137_v46 = vpop.f32.mrb[2].mxu1  ;;  %v2074_v47 = vpop.f32.mrb[3].mxu0 }
 0x10b   : > { %v1064_v48 = vadd.f32 %v2072_v42, %v632_v36  ;;  %v2075_v49 = vadd.f32 %v2074_v47, %v2073_v44  ;;  %v2138_v50 = vpop.f32.mrb[3].mxu1 }
 0x10c   : > { %v2139_v51 = vadd.f32 %v2138_v50, %v2137_v46 }
 0x10d   : > { %v3005_v52 = vadd.f32 %v2136_v45, %v1064_v48  ;;  %v1067_v53 = vadd.f32 %v2075_v49, %v637_v39  ;;  %v672_v45 = vpop.permute.xlu0 %671  ;;  %v677_v48 = vpop.permute.xlu1 %676 }
 0x10f   : > { %v3007_v54 = vadd.f32 %v2139_v51, %v1067_v53  ;;  %v2076_v55 = vpop.f32.mrb[4].mxu0 }
 0x110   : > { %v2140_v58 = vpop.f32.mrb[4].mxu1  ;;  %v2077_v59 = vpop.f32.mrb[5].mxu0 }
 0x111   : > { %v2078_v60 = vadd.f32 %v2077_v59, %v2076_v55  ;;  %v2141_v61 = vpop.f32.mrb[5].mxu1  ;;  %v2079_v62 = vpop.f32.mrb[6].mxu0 }
 0x112   : > { %v2142_v63 = vadd.f32 %v2141_v61, %v2140_v58  ;;  %v2143_v3 = vpop.f32.mrb[6].mxu1  ;;  %v2080_v0 = vpop.f32.mrb[7].mxu0 }
 0x113   : > { %v1072_v1 = vadd.f32 %v2078_v60, %v642_v37  ;;  %v2081_v5 = vadd.f32 %v2080_v0, %v2079_v62  ;;  %v2144_v6 = vpop.f32.mrb[7].mxu1 }
 0x114   : > { %v2145_v2 = vadd.f32 %v2144_v6, %v2143_v3 }
 0x115   : > { %v3009_v4 = vadd.f32 %v2142_v63, %v1072_v1  ;;  %v1075_v7 = vadd.f32 %v2081_v5, %v647_v57  ;;  %v682_v1 = vpop.permute.xlu0 %681 }
 0x117   : > { %v3011_v9 = vadd.f32 %v2145_v2, %v1075_v7  ;;  %v2082_v10 = vpop.f32.mrb[8].mxu0  ;;  %v687_v2 = vpop.permute.xlu1 %686 }
 0x118   : > { %v2146_v12 = vpop.f32.mrb[8].mxu1  ;;  %v2083_v13 = vpop.f32.mrb[9].mxu0 }
 0x119   : > { %v2084_v14 = vadd.f32 %v2083_v13, %v2082_v10  ;;  %v2147_v15 = vpop.f32.mrb[9].mxu1  ;;  %v2085_v16 = vpop.f32.mrb[10].mxu0 }
 0x11a   : > { %v2148_v17 = vadd.f32 %v2147_v15, %v2146_v12  ;;  %v2149_v18 = vpop.f32.mrb[10].mxu1  ;;  %v2086_v19 = vpop.f32.mrb[11].mxu0 }
 0x11b   : > { %v1080_v20 = vadd.f32 %v2084_v14, %v652_v8  ;;  %v2087_v21 = vadd.f32 %v2086_v19, %v2085_v16  ;;  %v2150_v22 = vpop.f32.mrb[11].mxu1 }
 0x11c   : > { %v2151_v23 = vadd.f32 %v2150_v22, %v2149_v18  ;;  %v692_v22 = vpop.permute.xlu0 %691 }
 0x11d   : > { %v3013_v24 = vadd.f32 %v2148_v17, %v1080_v20  ;;  %v1083_v25 = vadd.f32 %v2087_v21, %v657_v11 }
 0x11f   : > { %v3015_v27 = vadd.f32 %v2151_v23, %v1083_v25  ;;  %v2088_v28 = vpop.f32.mrb[12].mxu0 }
 0x120   : > { %v2152_v30 = vpop.f32.mrb[12].mxu1  ;;  %v2089_v31 = vpop.f32.mrb[13].mxu0 }
 0x121   : > { %v2090_v32 = vadd.f32 %v2089_v31, %v2088_v28  ;;  %v2153_v33 = vpop.f32.mrb[13].mxu1  ;;  %v2091_v34 = vpop.f32.mrb[14].mxu0 }
 0x122   : > { %v2154_v36 = vadd.f32 %v2153_v33, %v2152_v30  ;;  %v2155_v37 = vpop.f32.mrb[14].mxu1  ;;  %v2092_v38 = vpop.f32.mrb[15].mxu0 }
 0x123   : > { %v1088_v39 = vadd.f32 %v2090_v32, %v662_v26  ;;  %v2093_v40 = vadd.f32 %v2092_v38, %v2091_v34  ;;  %v2156_v41 = vpop.f32.mrb[15].mxu1  ;;  %v697_v26 = vpop.permute.xlu1 %696 }
 0x124   : > { %v2157_v42 = vadd.f32 %v2156_v41, %v2155_v37 }
 0x125   : > { %v3017_v43 = vadd.f32 %v2154_v36, %v1088_v39  ;;  %v1091_v44 = vadd.f32 %v2093_v40, %v667_v29 }
 0x127   : > { %v3019_v46 = vadd.f32 %v2157_v42, %v1091_v44  ;;  %v2094_v47 = vpop.f32.mrb[16].mxu0  ;;  %v702_v44 = vpop.permute.xlu0 %701 }
 0x128   : > { %v2158_v49 = vpop.f32.mrb[16].mxu1  ;;  %v2095_v50 = vpop.f32.mrb[17].mxu0 }
 0x129   : > { %v2096_v51 = vadd.f32 %v2095_v50, %v2094_v47  ;;  %v2159_v53 = vpop.f32.mrb[17].mxu1  ;;  %v2097_v55 = vpop.f32.mrb[18].mxu0 }
 0x12a   : > { %v2160_v57 = vadd.f32 %v2159_v53, %v2158_v49  ;;  %v2161_v58 = vpop.f32.mrb[18].mxu1  ;;  %v2098_v59 = vpop.f32.mrb[19].mxu0 }
 0x12b   : > { %v1096_v60 = vadd.f32 %v2096_v51, %v672_v45  ;;  %v2099_v61 = vadd.f32 %v2098_v59, %v2097_v55  ;;  %v2162_v62 = vpop.f32.mrb[19].mxu1  ;;  %v707_v47 = vpop.permute.xlu1 %706 }
 0x12c   : > { %v2163_v63 = vadd.f32 %v2162_v62, %v2161_v58 }
 0x12d   : > { %v3021_v3 = vadd.f32 %v2160_v57, %v1096_v60  ;;  %v1099_v0 = vadd.f32 %v2099_v61, %v677_v48 }
 0x12f   : > { %v3023_v5 = vadd.f32 %v2163_v63, %v1099_v0  ;;  %v2100_v6 = vpop.f32.mrb[20].mxu0 }
 0x130   : > { %v2164_v7 = vpop.f32.mrb[20].mxu1  ;;  %v2101_v8 = vpop.f32.mrb[21].mxu0 }
 0x131   : > { %v2102_v10 = vadd.f32 %v2101_v8, %v2100_v6  ;;  %v2165_v11 = vpop.f32.mrb[21].mxu1  ;;  %v2103_v12 = vpop.f32.mrb[22].mxu0 }
 0x132   : > { %v2166_v13 = vadd.f32 %v2165_v11, %v2164_v7  ;;  %v2167_v14 = vpop.f32.mrb[22].mxu1  ;;  %v2104_v15 = vpop.f32.mrb[23].mxu0 }
 0x133   : > { %v1104_v16 = vadd.f32 %v2102_v10, %v682_v1  ;;  %v2105_v17 = vadd.f32 %v2104_v15, %v2103_v12  ;;  %v2168_v18 = vpop.f32.mrb[23].mxu1 }
 0x134   : > { %v2169_v19 = vadd.f32 %v2168_v18, %v2167_v14 }
 0x135   : > { %v3025_v20 = vadd.f32 %v2166_v13, %v1104_v16  ;;  %v1107_v21 = vadd.f32 %v2105_v17, %v687_v2 }
 0x137   : > { %v3027_v23 = vadd.f32 %v2169_v19, %v1107_v21  ;;  %v2106_v25 = vpop.f32.mrb[24].mxu0 }
 0x138   : > { %v2170_v28 = vpop.f32.mrb[24].mxu1  ;;  %v2107_v29 = vpop.f32.mrb[25].mxu0 }
 0x139   : > { %v2108_v30 = vadd.f32 %v2107_v29, %v2106_v25  ;;  %v2171_v31 = vpop.f32.mrb[25].mxu1  ;;  %v2109_v32 = vpop.f32.mrb[26].mxu0 }
 0x13a   : > { %v2172_v33 = vadd.f32 %v2171_v31, %v2170_v28  ;;  %v2173_v34 = vpop.f32.mrb[26].mxu1  ;;  %v2110_v36 = vpop.f32.mrb[27].mxu0 }
 0x13b   : > { %v1112_v37 = vadd.f32 %v2108_v30, %v692_v22  ;;  %v2111_v38 = vadd.f32 %v2110_v36, %v2109_v32  ;;  %v2174_v39 = vpop.f32.mrb[27].mxu1 }
 0x13c   : > { %v2175_v40 = vadd.f32 %v2174_v39, %v2173_v34 }
 0x13d   : > { %v3029_v41 = vadd.f32 %v2172_v33, %v1112_v37  ;;  %v1115_v42 = vadd.f32 %v2111_v38, %v697_v26 }
 0x13f   : > { %v3031_v45 = vadd.f32 %v2175_v40, %v1115_v42  ;;  %v2112_v48 = vpop.f32.mrb[28].mxu0 }
 0x140   : > { %v2176_v49 = vpop.f32.mrb[28].mxu1  ;;  %v2113_v50 = vpop.f32.mrb[29].mxu0 }
 0x141   : > { %v2114_v51 = vadd.f32 %v2113_v50, %v2112_v48  ;;  %v2177_v53 = vpop.f32.mrb[29].mxu1  ;;  %v2115_v55 = vpop.f32.mrb[30].mxu0 }
 0x142   : > { %v2178_v57 = vadd.f32 %v2177_v53, %v2176_v49  ;;  %v2179_v58 = vpop.f32.mrb[30].mxu1  ;;  %v2116_v59 = vpop.f32.mrb[31].mxu0 }
 0x143   : > { %v1120_v60 = vadd.f32 %v2114_v51, %v702_v44  ;;  %v2117_v61 = vadd.f32 %v2116_v59, %v2115_v55  ;;  %v2180_v62 = vpop.f32.mrb[31].mxu1 }
 0x144   : > { %v2181_v63 = vadd.f32 %v2180_v62, %v2179_v58 }
 0x145   : > { %v3033_v0 = vadd.f32 %v2178_v57, %v1120_v60  ;;  %v1123_v1 = vadd.f32 %v2117_v61, %v707_v47 }
 0x147   : > { %v3035_v6 = vadd.f32 %v2181_v63, %v1123_v1  ;;  %v2198_v2 = vpop.f32.mrb[32].mxu0 }
 0x148   : > { %v2262_v7 = vpop.f32.mrb[32].mxu1  ;;  %v2199_v8 = vpop.f32.mrb[33].mxu0 }
 0x149   : > { %v2200_v10 = vadd.f32 %v2199_v8, %v2198_v2  ;;  %v2263_v11 = vpop.f32.mrb[33].mxu1  ;;  %v2201_v12 = vpop.f32.mrb[34].mxu0 }
 0x14a   : > { %v2264_v13 = vadd.f32 %v2263_v11, %v2262_v7  ;;  %v2265_v14 = vpop.f32.mrb[34].mxu1  ;;  %v2202_v15 = vpop.f32.mrb[35].mxu0 }
 0x14b   : > { %v1258_v16 = vadd.f32 %v2200_v10, %v3005_v52  ;;  %v2203_v17 = vadd.f32 %v2202_v15, %v2201_v12  ;;  %v2266_v18 = vpop.f32.mrb[35].mxu1 }
 0x14c   : > { %v2267_v19 = vadd.f32 %v2266_v18, %v2265_v14 }
 0x14d   : > { %v1355_v21 = vadd.f32 %v2264_v13, %v1258_v16  ;;  %v1261_v22 = vadd.f32 %v2203_v17, %v3007_v54 }
 0x14f   : > { %v1524_v25 = vmul.f32 %v1355_v21, %v1355_v21  ;;  %v1358_v26 = vadd.f32 %v2267_v19, %v1261_v22  ;;  %v2204_v28 = vpop.f32.mrb[36].mxu0 }
 0x150   : > { %v2268_v29 = vpop.f32.mrb[36].mxu1  ;;  %v2205_v30 = vpop.f32.mrb[37].mxu0 }
 0x151   : > { %v1525_v31 = vmul.f32 %v1358_v26, %v1358_v26  ;;  %v2392_v32 = vpack.c.bf16 %v1358_v26, %v1355_v21  ;;  %v2206_v33 = vadd.f32 %v2205_v30, %v2204_v28  ;;  %v2269_v34 = vpop.f32.mrb[37].mxu1  ;;  %v2207_v36 = vpop.f32.mrb[38].mxu0  ;;  %v1541_v39 = vsel %vm1540_vm1, %v1524_v25, 0.0 }
 0x152   : > { %v2270_v37 = vadd.f32 %v2269_v34, %v2268_v29  ;;  %v2271_v38 = vpop.f32.mrb[38].mxu1  ;;  %v2208_v52 = vpop.f32.mrb[39].mxu0 }
 0x153   : > { %v1542_v40 = vsel %vm1540_vm1, %v1525_v31, 0.0  ;;  %v1266_v54 = vadd.f32 %v2206_v33, %v3009_v4  ;;  %v2209_v42 = vadd.f32 %v2208_v52, %v2207_v36  ;;  %v2272_v44 = vpop.f32.mrb[39].mxu1  ;;  %2393 = vmatpush3.bf16.msra.mxu1 %v2392_v32 }
 0x154   : > { %v1543_v47 = vadd.f32 %v1542_v40, %v1541_v39  ;;  %v2273_v48 = vadd.f32 %v2272_v44, %v2271_v38  ;;  %2394 = vmatprep.subr.bf16.mxu1 %v2452_v35 }
 0x155   : > { %v1363_v49 = vadd.f32 %v2270_v37, %v1266_v54  ;;  %v1269_v50 = vadd.f32 %v2209_v42, %v3011_v9 }
 0x157   : > { %v1526_v51 = vmul.f32 %v1363_v49, %v1363_v49  ;;  %v1366_v53 = vadd.f32 %v2273_v48, %v1269_v50  ;;  %v2210_v55 = vpop.f32.mrb[40].mxu0 }
 0x158   : > { %v2274_v57 = vpop.f32.mrb[40].mxu1  ;;  %v2211_v58 = vpop.f32.mrb[41].mxu0 }
 0x159   : > { %v1544_v59 = vsel %vm1540_vm1, %v1526_v51, 0.0  ;;  %v1527_v60 = vmul.f32 %v1366_v53, %v1366_v53  ;;  %v2395_v61 = vpack.c.bf16 %v1366_v53, %v1363_v49  ;;  %v2212_v4 = vadd.f32 %v2211_v58, %v2210_v55  ;;  %v2275_v62 = vpop.f32.mrb[41].mxu1  ;;  %v2213_v63 = vpop.f32.mrb[42].mxu0 }
 0x15a   : > { %v1545_v1 = vadd.f32 %v1544_v59, %v1543_v47  ;;  %v2276_v2 = vadd.f32 %v2275_v62, %v2274_v57  ;;  %v2277_v7 = vpop.f32.mrb[42].mxu1  ;;  %v2214_v8 = vpop.f32.mrb[43].mxu0 }
 0x15b   : > { %v1546_v10 = vsel %vm1540_vm1, %v1527_v60, 0.0  ;;  %v1274_v9 = vadd.f32 %v2212_v4, %v3013_v24  ;;  %v2215_v11 = vadd.f32 %v2214_v8, %v2213_v63  ;;  %v2278_v12 = vpop.f32.mrb[43].mxu1  ;;  %2396 = vmatpush3.bf16.msra.mxu1 %v2395_v61 }
 0x15c   : > { %v1547_v13 = vadd.f32 %v1546_v10, %v1545_v1  ;;  %v2279_v14 = vadd.f32 %v2278_v12, %v2277_v7  ;;  %2397 = vmatprep.subr.bf16.mxu1 %v2452_v35 }
 0x15d   : > { %v1371_v15 = vadd.f32 %v2276_v2, %v1274_v9  ;;  %v1277_v16 = vadd.f32 %v2215_v11, %v3015_v27 }
 0x15f   : > { %v1528_v17 = vmul.f32 %v1371_v15, %v1371_v15  ;;  %v1374_v18 = vadd.f32 %v2279_v14, %v1277_v16  ;;  %v2216_v19 = vpop.f32.mrb[44].mxu0 }
 0x160   : > { %v2280_v21 = vpop.f32.mrb[44].mxu1  ;;  %v2217_v22 = vpop.f32.mrb[45].mxu0 }
 0x161   : > { %v1548_v25 = vsel %vm1540_vm1, %v1528_v17, 0.0  ;;  %v1529_v26 = vmul.f32 %v1374_v18, %v1374_v18  ;;  %v2398_v28 = vpack.c.bf16 %v1374_v18, %v1371_v15  ;;  %v2218_v24 = vadd.f32 %v2217_v22, %v2216_v19  ;;  %v2281_v29 = vpop.f32.mrb[45].mxu1  ;;  %v2219_v30 = vpop.f32.mrb[46].mxu0 }
 0x162   : > { %v1549_v31 = vadd.f32 %v1548_v25, %v1547_v13  ;;  %v2282_v32 = vadd.f32 %v2281_v29, %v2280_v21  ;;  %v2283_v33 = vpop.f32.mrb[46].mxu1  ;;  %v2220_v34 = vpop.f32.mrb[47].mxu0 }
 0x163   : > { %v1550_v36 = vsel %vm1540_vm1, %v1529_v26, 0.0  ;;  %v1282_v27 = vadd.f32 %v2218_v24, %v3017_v43  ;;  %v2221_v37 = vadd.f32 %v2220_v34, %v2219_v30  ;;  %v2284_v38 = vpop.f32.mrb[47].mxu1  ;;  %2399 = vmatpush3.bf16.msra.mxu1 %v2398_v28 }
 0x164   : > { %v1551_v52 = vadd.f32 %v1550_v36, %v1549_v31  ;;  %v2285_v39 = vadd.f32 %v2284_v38, %v2283_v33  ;;  %2400 = vmatprep.subr.bf16.mxu1 %v2452_v35 }
 0x165   : > { %v1379_v40 = vadd.f32 %v2282_v32, %v1282_v27  ;;  %v1285_v54 = vadd.f32 %v2221_v37, %v3019_v46 }
 0x167   : > { %v1530_v42 = vmul.f32 %v1379_v40, %v1379_v40  ;;  %v1382_v44 = vadd.f32 %v2285_v39, %v1285_v54  ;;  %v2222_v47 = vpop.f32.mrb[48].mxu0 }
 0x168   : > { %v2286_v48 = vpop.f32.mrb[48].mxu1  ;;  %v2223_v49 = vpop.f32.mrb[49].mxu0 }
 0x169   : > { %v1552_v50 = vsel %vm1540_vm1, %v1530_v42, 0.0  ;;  %v1531_v51 = vmul.f32 %v1382_v44, %v1382_v44  ;;  %v2401_v53 = vpack.c.bf16 %v1382_v44, %v1379_v40  ;;  %v2224_v43 = vadd.f32 %v2223_v49, %v2222_v47  ;;  %v2287_v55 = vpop.f32.mrb[49].mxu1  ;;  %v2225_v57 = vpop.f32.mrb[50].mxu0 }
 0x16a   : > { %v1553_v58 = vadd.f32 %v1552_v50, %v1551_v52  ;;  %v2288_v59 = vadd.f32 %v2287_v55, %v2286_v48  ;;  %v2289_v60 = vpop.f32.mrb[50].mxu1  ;;  %v2226_v61 = vpop.f32.mrb[51].mxu0 }
 0x16b   : > { %v1554_v4 = vsel %vm1540_vm1, %v1531_v51, 0.0  ;;  %v1290_v46 = vadd.f32 %v2224_v43, %v3021_v3  ;;  %v2227_v62 = vadd.f32 %v2226_v61, %v2225_v57  ;;  %v2290_v63 = vpop.f32.mrb[51].mxu1  ;;  %2402 = vmatpush3.bf16.msra.mxu1 %v2401_v53 }
 0x16c   : > { %v1555_v1 = vadd.f32 %v1554_v4, %v1553_v58  ;;  %v2291_v2 = vadd.f32 %v2290_v63, %v2289_v60  ;;  %2403 = vmatprep.subr.bf16.mxu1 %v2452_v35 }
 0x16d   : > { %v1387_v7 = vadd.f32 %v2288_v59, %v1290_v46  ;;  %v1293_v8 = vadd.f32 %v2227_v62, %v3023_v5 }
 0x16f   : > { %v1532_v10 = vmul.f32 %v1387_v7, %v1387_v7  ;;  %v1390_v9 = vadd.f32 %v2291_v2, %v1293_v8  ;;  %v2228_v11 = vpop.f32.mrb[52].mxu0 }
 0x170   : > { %v2292_v12 = vpop.f32.mrb[52].mxu1  ;;  %v2229_v13 = vpop.f32.mrb[53].mxu0 }
 0x171   : > { %v1556_v14 = vsel %vm1540_vm1, %v1532_v10, 0.0  ;;  %v1533_v15 = vmul.f32 %v1390_v9, %v1390_v9  ;;  %v2404_v16 = vpack.c.bf16 %v1390_v9, %v1387_v7  ;;  %v2230_v3 = vadd.f32 %v2229_v13, %v2228_v11  ;;  %v2293_v17 = vpop.f32.mrb[53].mxu1  ;;  %v2231_v18 = vpop.f32.mrb[54].mxu0 }
 0x172   : > { %v1557_v19 = vadd.f32 %v1556_v14, %v1555_v1  ;;  %v2294_v21 = vadd.f32 %v2293_v17, %v2292_v12  ;;  %v2295_v22 = vpop.f32.mrb[54].mxu1  ;;  %v2232_v25 = vpop.f32.mrb[55].mxu0  ;;  %v1435_v17 = vld [vmem:[%s3169_s6] sm:$0x1] }
 0x173   : > { %v1558_v26 = vsel %vm1540_vm1, %v1533_v15, 0.0  ;;  %v1298_v5 = vadd.f32 %v2230_v3, %v3025_v20  ;;  %v2233_v28 = vadd.f32 %v2232_v25, %v2231_v18  ;;  %v2296_v24 = vpop.f32.mrb[55].mxu1  ;;  %2405 = vmatpush3.bf16.msra.mxu1 %v2404_v16 }
 0x174   : > { %v1559_v29 = vadd.f32 %v1558_v26, %v1557_v19  ;;  %v2297_v30 = vadd.f32 %v2296_v24, %v2295_v22  ;;  %2406 = vmatprep.subr.bf16.mxu1 %v2452_v35 }
 0x175   : > { %v1395_v31 = vadd.f32 %v2294_v21, %v1298_v5  ;;  %v1301_v32 = vadd.f32 %v2233_v28, %v3027_v23 }
 0x177   : > { %v1534_v33 = vmul.f32 %v1395_v31, %v1395_v31  ;;  %v1398_v34 = vadd.f32 %v2297_v30, %v1301_v32  ;;  %v2234_v36 = vpop.f32.mrb[56].mxu0  ;;  %v1665_v32 = vpop.permute.xlu1 %1664 }
 0x178   : > { %v2298_v27 = vpop.f32.mrb[56].mxu1  ;;  %v2235_v37 = vpop.f32.mrb[57].mxu0 }
 0x179   : > { %v1560_v38 = vsel %vm1540_vm1, %v1534_v33, 0.0  ;;  %v1535_v52 = vmul.f32 %v1398_v34, %v1398_v34  ;;  %v2407_v39 = vpack.c.bf16 %v1398_v34, %v1395_v31  ;;  %v2236_v20 = vadd.f32 %v2235_v37, %v2234_v36  ;;  %v2299_v40 = vpop.f32.mrb[57].mxu1  ;;  %v2237_v54 = vpop.f32.mrb[58].mxu0 }
 0x17a   : > { %v1561_v42 = vadd.f32 %v1560_v38, %v1559_v29  ;;  %v2300_v44 = vadd.f32 %v2299_v40, %v2298_v27  ;;  %v2301_v47 = vpop.f32.mrb[58].mxu1  ;;  %v2238_v48 = vpop.f32.mrb[59].mxu0  ;;  %v1661_v33 = vlaneseq }
 0x17b   : > { %v1562_v49 = vsel %vm1540_vm1, %v1535_v52, 0.0  ;;  %v1306_v23 = vadd.f32 %v2236_v20, %v3029_v41  ;;  %v2239_v50 = vadd.f32 %v2238_v48, %v2237_v54  ;;  %v2302_v51 = vpop.f32.mrb[59].mxu1  ;;  %2408 = vmatpush3.bf16.msra.mxu1 %v2407_v39  ;;  %v1668_v27 = vpop.permute.xlu1 %1667 }
 0x17c   : > { %v1563_v53 = vadd.f32 %v1562_v49, %v1561_v42  ;;  %v2303_v43 = vadd.f32 %v2302_v51, %v2301_v47  ;;  %2409 = vmatprep.subr.bf16.mxu1 %v2452_v35  ;;  %v3079_v36 = vand.u32 127, %v1661_v33 }
 0x17d   : > { %v1403_v55 = vadd.f32 %v2300_v44, %v1306_v23  ;;  %v1309_v57 = vadd.f32 %v2239_v50, %v3031_v45 }
 0x17e   : > { %vm1669_vm3 = vcmp.eq.s32.totalorder %v3079_v36, %v1665_v32  ;;  %vm1670_vm4 = vcmp.eq.s32.totalorder %v3079_v36, %v1668_v27 }
 0x17f   : > { %v1536_v58 = vmul.f32 %v1403_v55, %v1403_v55  ;;  %v1406_v59 = vadd.f32 %v2303_v43, %v1309_v57  ;;  %v2240_v60 = vpop.f32.mrb[60].mxu0  ;;  %v2038_v38 = vsel %vm1669_vm3, 1.0, %v2450_v56  ;;  %v2039_v52 = vsel %vm1670_vm4, 1.0, %v2450_v56 }
 0x180   : > { %v2304_v61 = vpop.f32.mrb[60].mxu1  ;;  %v2241_v4 = vpop.f32.mrb[61].mxu0  ;;  %v1675_v20 = vsel %vm1540_vm1, %v2038_v38, -inf  ;;  %v1676_v40 = vsel %vm1540_vm1, %v2039_v52, -inf }
 0x181   : > { %v1564_v46 = vsel %vm1540_vm1, %v1536_v58, 0.0  ;;  %v1537_v62 = vmul.f32 %v1406_v59, %v1406_v59  ;;  %v2410_v63 = vpack.c.bf16 %v1406_v59, %v1403_v55  ;;  %v2242_v41 = vadd.f32 %v2241_v4, %v2240_v60  ;;  %v2305_v1 = vpop.f32.mrb[61].mxu1  ;;  %v2243_v2 = vpop.f32.mrb[62].mxu0 }
 0x182   : > { %v1565_v7 = vadd.f32 %v1564_v46, %v1563_v53  ;;  %v2306_v8 = vadd.f32 %v2305_v1, %v2304_v61  ;;  %v2307_v10 = vpop.f32.mrb[62].mxu1  ;;  %v2244_v9 = vpop.f32.mrb[63].mxu0  ;;  %v1677_v42 = vmax.f32 %v1675_v20, %v1676_v40  ;;  %v1749_v40 = vld [vmem:[%s3095_s21 + $0x28] sm:$0xff] }
 0x183   : > { %v1566_v11 = vsel %vm1540_vm1, %v1537_v62, 0.0  ;;  %v1314_v45 = vadd.f32 %v2242_v41, %v3033_v0  ;;  %v2245_v12 = vadd.f32 %v2244_v9, %v2243_v2  ;;  %v2308_v13 = vpop.f32.mrb[63].mxu1  ;;  %2411 = vmatpush3.bf16.msra.mxu1 %v2410_v63 }
 0x184   : > { %v1567_v14 = vadd.f32 %v1566_v11, %v1565_v7  ;;  %v2309_v15 = vadd.f32 %v2308_v13, %v2307_v10  ;;  %2412 = vmatprep.subr.bf16.mxu1 %v2452_v35  ;;  %v1678_v47 = vrot.slane %v1677_v42, 4  ;;  %v1708_v13 = vshrl.u32 %v1661_v33, 7 }
 0x185   : > { %v1411_v16 = vadd.f32 %v2306_v8, %v1314_v45  ;;  %v1317_v3 = vadd.f32 %v2245_v12, %v3035_v6 }
 0x186   : > { %v1679_v49 = vmax.f32 %v1677_v42, %v1678_v47  ;;  %v1715_v33 = vadd.s32 56, %v1708_v13 }
 0x187   : > { %v1538_v18 = vmul.f32 %v1411_v16, %v1411_v16  ;;  %v1414_v19 = vadd.f32 %v2309_v15, %v1317_v3  ;;  %v1518_v21 = vpop.f32.mrb[64].mxu0 }
 0x188   : > { %v1519_v22 = vadd.f32 %v1518_v21, %v1435_v17  ;;  %v2354_v25 = vpop.f32.mrb[65].mxu0  ;;  %v1680_v53 = vrot.slane %v1679_v49, 2  ;;  %v1709_v17 = vadd.s32 8, %v1708_v13 }
 0x189   : > { %v1568_v0 = vsel %vm1540_vm1, %v1538_v18, 0.0  ;;  %v1539_v26 = vmul.f32 %v1414_v19, %v1414_v19  ;;  %v2413_v5 = vpack.c.bf16 %v1414_v19, %v1411_v16  ;;  %v1521_v28 = vpop.f32.mrb[66].mxu0  ;;  %v1718_v16 = vsub.s32 0, %v1708_v13 }
 0x18a   : > { %v1569_v24 = vadd.f32 %v1568_v0, %v1567_v14  ;;  %v2355_v35 = vpop.f32.mrb[67].mxu0  ;;  %v1580_v29 = vmul.f32 %v1519_v22, %v1519_v22  ;;  %v1681_v43 = vmax.f32 %v1679_v49, %v1680_v53  ;;  %v1710_v18 = vadd.s32 16, %v1708_v13  ;;  %v1745_v28 = vld [vmem:[%s3095_s21 + $0x8] sm:$0xff] }
 0x18b   : > { %v1570_v6 = vsel %vm1540_vm1, %v1539_v26, 0.0  ;;  %2414 = vmatpush3.bf16.msra.mxu1 %v2413_v5  ;;  %v1711_v19 = vadd.s32 24, %v1708_v13  ;;  %v1713_v0 = vadd.s32 40, %v1708_v13  ;;  %v1744_v26 = vld [vmem:[%s3095_s21] sm:$0xff]  ;;  %v1714_v5 = vadd.s32 48, %v1708_v13 }
 0x18c   : > { %v1571_v30 = vadd.f32 %v1570_v6, %v1569_v24  ;;  %v1582_v31 = vsel %vm1581_vm2, %v1580_v29, 0.0  ;;  %v1682_v55 = vrot.slane %v1681_v43, 1  ;;  %v1746_v24 = vld [vmem:[%s3095_s21 + $0x10] sm:$0xff] }
 0x18d   : > { %1583 = vadd.xlane.f32.xlu0 %v1582_v31 }
 0x18e   : > { %2389 = vmatmul.mubr.f32.vlgmr.msra.gmra.mrb[64].mxu1 %v1519_v22  ;;  %v1572_v34 = vrot.slane %v1571_v30, 4  ;;  %v1683_v59 = vmax.f32 %v1681_v43, %v1682_v55  ;;  %v1712_v22 = vadd.s32 32, %v1708_v13  ;;  %v1751_v43 = vld [vmem:[%s3095_s21 + $0x38] sm:$0xff] }
 0x190   : > { %v1573_v37 = vadd.f32 %v1572_v34, %v1571_v30  ;;  %vm1684_vm6 = vcmp.gt.f32.partialorder %v1683_v59, 0.5  ;;  %v1747_v30 = vld [vmem:[%s3095_s21 + $0x18] sm:$0xff] }
 0x192   : > { %v1574_v39 = vrot.slane %v1573_v37, 2 }
 0x194   : > { %v1575_v54 = vadd.f32 %v1574_v39, %v1573_v37  ;;  %v1748_v37 = vld [vmem:[%s3095_s21 + $0x20] sm:$0xff] }
 0x196   : > { %v1576_v44 = vrot.slane %v1575_v54, 1 }
 0x198   : > { %v1577_v48 = vadd.f32 %v1576_v44, %v1575_v54 }
 0x19a   : > { %v1578_v50 = vadd.f32 1e-06, %v1577_v48 }
 0x19c   : > { %2437 = vrsqrt.f32 %v1578_v50 }
 0x1a6   : > { %v2438_v57 = vpop.eup %2437 }
 0x21a   : > { %v1584_v23 = vpop.xlane.xlu0 %1583 }
 0x21b   : > { %v1585_v51 = vadd.f32 1e-06, %v1584_v23  ;;  %v1750_v23 = vld [vmem:[%s3095_s21 + $0x30] sm:$0xff] }
 0x21d   : > { %2439 = vrsqrt.f32 %v1585_v51 }
 0x227   : > { %v2440_v4 = vpop.eup %2439 }
 0x261   : > { %v1653_v58 = vpop.f32.mrb[64].mxu1 }
 0x262   : > { %v1657_v60 = vmul.f32 %v2438_v57, %v1653_v58  ;;  %v2390_v61 = vpop.f32.mrb[65].mxu1 }
 0x264   : > { %v1658_v46 = vmul.f32 %v2440_v4, %v1657_v60 }
 0x266   : > { %v1685_v62 = vsel %vm1684_vm6, %v1658_v46, -1e+30 }
 0x267   : > { %v1687_v63 = vsel %vm1686_vm5, %v1685_v62, -inf }
 0x268   : > { %1688 = vmax.xlane.f32.xlu1 %v1687_v63 }
 0x2f5   : > { %v3087_v41 = vpop.xlane.xlu1 %1688 }
 0x2f6   : > { %vm1690_vm7 = vcmp.ge.f32.partialorder %v1685_v62, %v3087_v41 }
 0x2f7   : > { %v1691_v1 = vsel %vm1690_vm7, %v3079_v36, 64 }
 0x2f8   : > { %v1692_v2 = vsel %vm1686_vm5, %v1691_v1, 2147483647 }
 0x2f9   : > { %v1694_v7 = vshra.s32 %v1692_v2, 16  ;;  %v1693_v10 = vand.u32 65535, %v1692_v2 }
 0x2fb   : > { %v1696_v8 = vcvt.s32.f32 %v1694_v7  ;;  %v1695_v11 = vcvt.s32.f32 %v1693_v10 }
 0x2fd   : > { %1697 = vmin.xlane.f32.xlu0 %v1696_v8 }
 0x38a   : > { %v1698_v9 = vpop.xlane.xlu0 %1697 }
 0x38b   : > { %vm1699_vm8 = vcmp.eq.f32.partialorder %v1696_v8, %v1698_v9  ;;  %v1704_v12 = vcvt.f32.s32 %v1698_v9 }
 0x38c   : > { %v1700_v45 = vsel %vm1699_vm8, %v1695_v11, inf }
 0x38d   : > { %1701 = vmin.xlane.f32.xlu0 %v1700_v45  ;;  %v1705_v15 = vshll.u32 %v1704_v12, 16 }
 0x41a   : > { %v1702_v14 = vpop.xlane.xlu0 %1701 }
 0x41b   : > { %v1703_v3 = vcvt.f32.s32 %v1702_v14 }
 0x41d   : > { %v1706_v21 = vadd.s32 %v1705_v15, %v1703_v3 }
 0x41f   : > { %v1719_v25 = vrot.slane %v1706_v21, %v1718_v16 }
 0x421   : > { %vm1720_vm9 = vcmp.eq.s32.totalorder %v1708_v13, %v1719_v25  ;;  %vm1721_vm10 = vcmp.eq.s32.totalorder %v1709_v17, %v1719_v25  ;;  %vm1722_vm11 = vcmp.eq.s32.totalorder %v1710_v18, %v1719_v25  ;;  %vm1723_vm12 = vcmp.eq.s32.totalorder %v1711_v19, %v1719_v25 }
 0x422   : > { %vm1724_vm14 = vcmp.eq.s32.totalorder %v1712_v22, %v1719_v25  ;;  %v2040_v35 = vsel %vm1720_vm9, 1.0, %v2450_v56  ;;  %v2041_v29 = vsel %vm1721_vm10, 1.0, %v2450_v56  ;;  %v2042_v6 = vsel %vm1722_vm11, 1.0, %v2450_v56 }
 0x423   : > { %v2043_v31 = vsel %vm1723_vm12, 1.0, %v2450_v56  ;;  %v1752_v32 = vmul.f32 %v2040_v35, %v1744_v26  ;;  %vm1725_vm15 = vcmp.eq.s32.totalorder %v1713_v0, %v1719_v25  ;;  %v1753_v34 = vmul.f32 %v2041_v29, %v1745_v28 }
 0x424   : > { %v1754_v27 = vmul.f32 %v2042_v6, %v1746_v24  ;;  %v2044_v38 = vsel %vm1724_vm14, 1.0, %v2450_v56  ;;  %vm1726_vm0 = vcmp.eq.s32.totalorder %v1714_v5, %v1719_v25  ;;  %v1755_v39 = vmul.f32 %v2043_v31, %v1747_v30 }
 0x425   : > { %v1761_v52 = vsel %vm1760_vm13, %v1752_v32, 0.0  ;;  %v1762_v20 = vsel %vm1760_vm13, %v1753_v34, 0.0  ;;  %v2045_v54 = vsel %vm1725_vm15, 1.0, %v2450_v56  ;;  %vm1727_vm1 = vcmp.eq.s32.totalorder %v1715_v33, %v1719_v25 }
 0x426   : > { %v1763_v42 = vadd.f32 %v1762_v20, %v1761_v52  ;;  %v1756_v44 = vmul.f32 %v2044_v38, %v1748_v37  ;;  %v1764_v47 = vsel %vm1760_vm13, %v1754_v27, 0.0  ;;  %v2046_v48 = vsel %vm1726_vm0, 1.0, %v2450_v56 }
 0x427   : > { %v1757_v50 = vmul.f32 %v2045_v54, %v1749_v40  ;;  %v1766_v51 = vsel %vm1760_vm13, %v1755_v39, 0.0  ;;  %v2047_v53 = vsel %vm1727_vm1, 1.0, %v2450_v56  ;;  %v1758_v57 = vmul.f32 %v2046_v48, %v1750_v23 }
 0x428   : > { %v1765_v49 = vadd.f32 %v1764_v47, %v1763_v42  ;;  %v1768_v58 = vsel %vm1760_vm13, %v1756_v44, 0.0  ;;  %v1759_v60 = vmul.f32 %v2047_v53, %v1751_v43  ;;  %v1786_v56 = vand.u32 7, %v3079_v36 }
 0x429   : > { %v1770_v61 = vsel %vm1760_vm13, %v1757_v50, 0.0  ;;  %v1772_v46 = vsel %vm1760_vm13, %v1758_v57, 0.0 }
 0x42a   : > { %v1767_v55 = vadd.f32 %v1766_v51, %v1765_v49  ;;  %v1774_v63 = vsel %vm1760_vm13, %v1759_v60, 0.0  ;;  %vm1794_vm2 = vcmp.eq.s32.totalorder %v1786_v56, 4  ;;  %vm1840_vm6 = vcmp.eq.s32.totalorder %v1786_v56, 3 }
 0x42b   : > { %vm1834_vm9 = vcmp.eq.s32.totalorder %v1786_v56, 2  ;;  %vm1828_vm11 = vcmp.eq.s32.totalorder %v1786_v56, 1  ;;  %vm1822_vm14 = vcmp.eq.s32.totalorder %v1786_v56, 0 }
 0x42c   : > { %v1769_v59 = vadd.f32 %v1768_v58, %v1767_v55 }
 0x42e   : > { %v1771_v4 = vadd.f32 %v1770_v61, %v1769_v59 }
 0x430   : > { %v1773_v62 = vadd.f32 %v1772_v46, %v1771_v4 }
 0x432   : > { %v1775_v1 = vadd.f32 %v1774_v63, %v1773_v62 }
 0x434   : > { %v1776_v2 = vrot.slane %v1775_v1, 4 }
 0x436   : > { %v1777_v7 = vadd.f32 %v1776_v2, %v1775_v1 }
 0x438   : > { %v1778_v8 = vrot.slane %v1777_v7, 2 }
 0x43a   : > { %v1779_v10 = vadd.f32 %v1778_v8, %v1777_v7 }
 0x43c   : > { %v1780_v9 = vrot.slane %v1779_v10, 1 }
 0x43e   : > { %v1781_v11 = vadd.f32 %v1780_v9, %v1779_v10 }
 0x440   : > { %v1795_v45 = vsel %vm1794_vm2, %v1781_v11, -1e+30 }
 0x441   : > { %v1796_v12 = vsel %vm1760_vm13, %v1795_v45, -inf }
 0x442   : > { %1797 = vmax.xlane.f32.xlu0 %v1796_v12 }
 0x4cf   : > { %v1798_v13 = vpop.xlane.xlu0 %1797 }
 0x4d0   : > { %vm1799_vm3 = vcmp.ge.f32.partialorder %v1781_v11, %v1798_v13 }
 0x4d1   : > { %vm1800_vm4 = vmand %vm1794_vm2, %vm1799_vm3 }
 0x4d2   : > { %v1801_v14 = vsel %vm1800_vm4, %v3079_v36, 24  ;;  %vm1859_vm4 = vcmp.eq.s32.totalorder %v3079_v36, 1 }
 0x4d3   : > { %v1802_v15 = vsel %vm1760_vm13, %v1801_v14, 2147483647 }
 0x4d4   : > { %v1804_v16 = vshra.s32 %v1802_v15, 16  ;;  %v1803_v17 = vand.u32 65535, %v1802_v15 }
 0x4d6   : > { %v1806_v3 = vcvt.s32.f32 %v1804_v16  ;;  %v1805_v19 = vcvt.s32.f32 %v1803_v17 }
 0x4d8   : > { %1807 = vmin.xlane.f32.xlu0 %v1806_v3 }
 0x565   : > { %v1808_v18 = vpop.xlane.xlu0 %1807 }
 0x566   : > { %vm1809_vm5 = vcmp.eq.f32.partialorder %v1806_v3, %v1808_v18  ;;  %v1814_v22 = vcvt.f32.s32 %v1808_v18 }
 0x567   : > { %v1810_v21 = vsel %vm1809_vm5, %v1805_v19, inf  ;;  %vm1862_vm5 = vcmp.eq.s32.totalorder %v3079_v36, 2 }
 0x568   : > { %1811 = vmin.xlane.f32.xlu1 %v1810_v21  ;;  %v1815_v0 = vshll.u32 %v1814_v22, 16 }
 0x5f5   : > { %v1812_v25 = vpop.xlane.xlu1 %1811 }
 0x5f6   : > { %v1813_v26 = vcvt.f32.s32 %v1812_v25 }
 0x5f8   : > { %v1816_v5 = vadd.s32 %v1815_v0, %v1813_v26 }
 0x5fa   : > { %v2048_v28 = vadd.s32 4294967292, %v1816_v5 }
 0x5fc   : > { %v1819_v24 = vadd.s32 8, %v2048_v28  ;;  %vm1818_vm7 = vcmp.ge.s32.totalorder %v3079_v36, %v2048_v28 }
 0x5fe   : > { %vm1820_vm8 = vcmp.lt.s32.totalorder %v3079_v36, %v1819_v24 }
 0x5ff   : > { %vm3129_vm10 = vmand %vm1818_vm7, %vm1820_vm8  ;;  %vm1871_vm7 = vcmp.eq.s32.totalorder %v3079_v36, 5 }
 0x600   : > { %vm1841_vm12 = vmand %vm3129_vm10, %vm1840_vm6  ;;  %vm1868_vm6 = vcmp.eq.s32.totalorder %v3079_v36, 4  ;;  %v1872_v61 = vsel %vm1871_vm7, %v3087_v41, 0.0 }
 0x601   : > { %v1842_v29 = vsel %vm1841_vm12, %v1781_v11, 0.0  ;;  %vm1835_vm15 = vmand %vm3129_vm10, %vm1834_vm9 }
 0x602   : > { %v1843_v6 = vsel %vm1760_vm13, %v1842_v29, 0.0  ;;  %v1836_v30 = vsel %vm1835_vm15, %v1781_v11, 0.0  ;;  %vm1829_vm0 = vmand %vm3129_vm10, %vm1828_vm11 }
 0x603   : > { %1844 = vadd.xlane.f32.xlu1 %v1843_v6  ;;  %v1837_v31 = vsel %vm1760_vm13, %v1836_v30, 0.0  ;;  %v1830_v32 = vsel %vm1829_vm0, %v1781_v11, 0.0  ;;  %vm1823_vm1 = vmand %vm3129_vm10, %vm1822_vm14 }
 0x604   : > { %1838 = vadd.xlane.f32.xlu0 %v1837_v31  ;;  %v1824_v33 = vsel %vm1823_vm1, %v1781_v11, 0.0  ;;  %vm1846_vm3 = vmand %vm3129_vm10, %vm1794_vm2  ;;  %v1831_v34 = vsel %vm1760_vm13, %v1830_v32, 0.0  ;;  %vm1857_vm2 = vcmp.eq.s32.totalorder %v3079_v36, 0 }
 0x605   : > { %v1825_v27 = vsel %vm1760_vm13, %v1824_v33, 0.0  ;;  %v1847_v37 = vsel %vm1846_vm3, %v1781_v11, 0.0 }
 0x606   : > { %v1848_v38 = vsel %vm1760_vm13, %v1847_v37, 0.0  ;;  %vm1865_vm13 = vcmp.eq.s32.totalorder %v3079_v36, 3 }
 0x607   : > { %1832 = vadd.xlane.f32.xlu1 %v1831_v34 }
 0x608   : > { %1826 = vadd.xlane.f32.xlu0 %v1825_v27 }
 0x60c   : > { %1849 = vadd.xlane.f32.xlu0 %v1848_v38 }
 0x690   : > { %v1845_v52 = vpop.xlane.xlu1 %1844 }
 0x691   : > { %v1839_v39 = vpop.xlane.xlu0 %1838  ;;  %v1853_v20 = vmul.f32 0.5, %v1845_v52 }
 0x692   : > { %v1851_v40 = vmul.f32 0.5, %v1839_v39 }
 0x694   : > { %v1833_v54 = vpop.xlane.xlu1 %1832 }
 0x695   : > { %v1854_v42 = vsub.f32 %v1833_v54, %v1853_v20  ;;  %v1827_v44 = vpop.xlane.xlu0 %1826 }
 0x696   : > { %v1852_v47 = vsub.f32 %v1827_v44, %v1851_v40 }
 0x697   : > { %v1860_v48 = vsel %vm1859_vm4, %v1854_v42, 0.0  ;;  %v1856_v49 = vadd.f32 %v1854_v42, %v1845_v52 }
 0x698   : > { %v1855_v23 = vadd.f32 %v1852_v47, %v1839_v39  ;;  %v1858_v50 = vsel %vm1857_vm2, %v1852_v47, 0.0 }
 0x699   : > { %v1861_v51 = vadd.f32 %v1860_v48, %v1858_v50  ;;  %v1850_v55 = vpop.xlane.xlu0 %1849  ;;  %v1866_v57 = vsel %vm1865_vm13, %v1856_v49, 0.0 }
 0x69a   : > { %v1863_v53 = vsel %vm1862_vm5, %v1855_v23, 0.0  ;;  %v1869_v59 = vsel %vm1868_vm6, %v1850_v55, 0.0 }
 0x69b   : > { %v1864_v43 = vadd.f32 %v1863_v53, %v1861_v51 }
 0x69d   : > { %v1867_v58 = vadd.f32 %v1866_v57, %v1864_v43 }
 0x69f   : > { %v1870_v60 = vadd.f32 %v1869_v59, %v1867_v58 }
 0x6a1   : > { %v1873_v4 = vadd.f32 %v1872_v61, %v1870_v60 }
 0x6a3   : > { %1874 = vst [vmem:[%s355_s24] sm:$0x1] %v1873_v4 }
 0x6a4 PF: > { %s18_s27 = sadd.s32 1, %s2447_s27  }
 0x6a5   : > { %p15_p4 = scmp.ge.s32.totalorder %s18_s27, 4  }
 0x6a7   :  { %17 = sbr.rel (!%p15_p4) target bundleno = 1 (0x1), region = 91 }

</bundles_post_ra>
